<compile_context>
chip_gen: v6e
topology: v6e:2x2x1
jax: 0.10.0
libtpu: 0.0.40
codegen_flags: <defaults>
</compile_context>

<pallas_src>
import functools

import jax
import jax.numpy as jnp
from jax.experimental import pallas as pl
from jax.experimental.pallas import tpu as pltpu


# ---------------------------------------------------------------------------
# Kernels: patch build (K-concatenated taps) + single matmul + fused epilogue
# ---------------------------------------------------------------------------

def _build_patch(x_ref, patch_ref, *, kh, kw, stride, th, wout, cin):
    """Write the kh*kw tap windows into the patch scratch as contiguous
    K-columns: patch[:, t*cin:(t+1)*cin] = tap t (t = i*kw + j)."""
    s = stride
    thw = th * wout
    for i in range(kh):
        for j in range(kw):
            t = i * kw + j
            ph = (i % s) * s + (j % s)          # space-to-depth phase
            r0, c0 = i // s, j // s             # static offset inside phase
            win = x_ref[ph, r0:r0 + th, c0:c0 + wout, :]     # (th, wout, cin)
            patch_ref[:, t * cin:(t + 1) * cin] = win.reshape(thw, cin)


def _conv_bn_act_kernel(x_ref, w_ref, b_ref, o_ref, patch_ref, *,
                        kh, kw, stride, th, wout, cin, relu):
    _build_patch(x_ref, patch_ref, kh=kh, kw=kw, stride=stride,
                 th=th, wout=wout, cin=cin)
    acc = jnp.dot(patch_ref[...], w_ref[...],
                  preferred_element_type=jnp.float32)
    acc = acc + b_ref[...]
    if relu:
        acc = jnp.maximum(acc, 0.0)
    o_ref[...] = acc.astype(o_ref.dtype)


def _conv_bn_scfold_act_kernel(x_ref, xs_ref, w_ref, b_ref, o_ref, patch_ref,
                               *, kh, kw, stride, th, wout, cin, csc, relu):
    # Projection shortcut folded into the contraction: extra K columns.
    _build_patch(x_ref, patch_ref, kh=kh, kw=kw, stride=stride,
                 th=th, wout=wout, cin=cin)
    k0 = kh * kw * cin
    patch_ref[:, k0:k0 + csc] = xs_ref[...]
    acc = jnp.dot(patch_ref[...], w_ref[...],
                  preferred_element_type=jnp.float32)
    acc = acc + b_ref[...]
    if relu:
        acc = jnp.maximum(acc, 0.0)
    o_ref[...] = acc.astype(o_ref.dtype)


def _conv_bn_scadd_act_kernel(x_ref, xs_ref, w_ref, b_ref, o_ref, patch_ref,
                              *, kh, kw, stride, th, wout, cin, relu):
    # Identity shortcut: direct f32 add of the residual tile (no matmul).
    _build_patch(x_ref, patch_ref, kh=kh, kw=kw, stride=stride,
                 th=th, wout=wout, cin=cin)
    acc = jnp.dot(patch_ref[...], w_ref[...],
                  preferred_element_type=jnp.float32)
    acc = acc + xs_ref[...].astype(jnp.float32) + b_ref[...]
    if relu:
        acc = jnp.maximum(acc, 0.0)
    o_ref[...] = acc.astype(o_ref.dtype)


# ---------------------------------------------------------------------------
# Wrapper helpers
# ---------------------------------------------------------------------------

def _round_up(v, m):
    return ((v + m - 1) // m) * m


def _vmem_capacity_bytes():
    try:
        info = pltpu.get_tpu_info()
        cap = int(getattr(info, "vmem_capacity_bytes", 0) or 0)
        if cap > 0:
            return cap
    except Exception:
        pass
    return 64 * 1024 * 1024   # conservative default (v7x per-core VMEM)


def _padded_vmem_bytes(shape, dtype):
    """Per-buffer VMEM footprint including (sublane, lane) tile padding."""
    itemsize = jnp.dtype(dtype).itemsize
    shp = [int(d) for d in shape]
    shp[-1] = _round_up(shp[-1], 128)
    if len(shp) >= 2:
        shp[-2] = _round_up(shp[-2], 8 * max(1, 4 // itemsize))
    n = 1
    for d in shp:
        n *= d
    return n * itemsize


# ---------------------------------------------------------------------------
# Fused conv(kxk, pad=(k-1)//2, stride) * BN-scale + bias [+residual] [+ReLU]
# ---------------------------------------------------------------------------

def _conv_bn_pallas(x_nhwc, w_hwio, scale, bias, *, stride, relu,
                    shortcut=None, out_dtype=jnp.float32):
    """shortcut is None, ("add", xs) for identity residual, or
    ("fold", xs, wsc, bsc) for the 1x1-conv+BN projection residual (folded
    into the matmul).  Returns (out[N, Hout, Wout, Coutp], Coutp); Cout is
    zero-padded to a lane-dense multiple of 128."""
    N, H, W, Cin = x_nhwc.shape
    kh, kw, wcin, Cout = w_hwio.shape
    assert wcin == Cin
    s = int(stride)
    pad = (kh - 1) // 2
    Hout = (H + 2 * pad - kh) // s + 1
    Wout = (W + 2 * pad - kw) // s + 1

    sc_mode = None if shortcut is None else shortcut[0]
    Csc = shortcut[1].shape[-1] if sc_mode == "fold" else 0

    # Lane-dense output channels; Cout tile capped at 256.
    Coutp = _round_up(max(Cout, 128), 128)
    TCO = 256 if Coutp % 256 == 0 else 128
    n_co = Coutp // TCO

    halo_h = (kh - 1) // s
    halo_w = (kw - 1) // s
    Wq = Wout + halo_w
    K0 = kh * kw * Cin
    Ktot = K0 + Csc
    out_isz = jnp.dtype(out_dtype).itemsize
    vmem_cap = _vmem_capacity_bytes()

    def footprint(th):
        thw = th * Wout
        fb = 2 * _padded_vmem_bytes((s * s, th + halo_h, Wq, Cin), jnp.bfloat16)
        fb += 2 * _padded_vmem_bytes((Ktot, TCO), jnp.bfloat16)
        fb += 2 * _padded_vmem_bytes((1, TCO), jnp.float32)
        fb += 2 * _padded_vmem_bytes((thw, TCO), out_dtype)
        fb += _padded_vmem_bytes((thw, Ktot), jnp.bfloat16)      # patch scratch
        fb += _padded_vmem_bytes((thw, TCO), jnp.float32)        # live f32 acc
        if sc_mode == "add":
            fb += 2 * _padded_vmem_bytes((thw, TCO), jnp.bfloat16)
        elif sc_mode == "fold":
            fb += 2 * _padded_vmem_bytes((thw, Csc), jnp.bfloat16)
        return fb

    budget = max(8 << 20, int(vmem_cap * 0.35))
    TH = Hout
    while TH > 8 and footprint(TH) > budget:
        TH = max(8, _round_up((TH + 1) // 2, 8))
    n_rt = -(-Hout // TH)
    Hout_pad = n_rt * TH
    THW = TH * Wout
    vmem_limit = int(min(int(vmem_cap * 0.9),
                         max(32 << 20, int(footprint(TH) * 1.5) + (8 << 20))))

    # -- operand prep (plain JAX; constant-folded / fused under jit) ---------
    # BN scale folded into the weights; taps concatenated along K in the same
    # (i, j, cin) order the kernel writes the patch scratch.
    wf = w_hwio.astype(jnp.float32) * scale.astype(jnp.float32)[None, None, None, :]
    wf = jnp.pad(wf, ((0, 0), (0, 0), (0, 0), (0, Coutp - Cout))).reshape(K0, Coutp)
    bf = jnp.pad(bias.astype(jnp.float32), (0, Coutp - Cout))

    xs_arg = None
    if sc_mode == "fold":
        _, xs, wsc, bsc = shortcut
        assert xs.shape == (N, Hout, Wout, Csc), xs.shape
        wscp = jnp.pad(wsc.astype(jnp.float32), ((0, 0), (0, Coutp - Cout)))
        wf = jnp.concatenate([wf, wscp], axis=0)                 # (Ktot, Coutp)
        bf = bf + jnp.pad(bsc.astype(jnp.float32), (0, Coutp - Cout))
        xs = jnp.pad(xs.astype(jnp.bfloat16),
                     ((0, 0), (0, Hout_pad - Hout), (0, 0), (0, 0)))
        xs_arg = xs.reshape(N, n_rt, THW, Csc)
    elif sc_mode == "add":
        _, xs = shortcut
        assert xs.shape == (N, Hout, Wout, Cout), xs.shape
        xs = jnp.pad(xs.astype(jnp.bfloat16),
                     ((0, 0), (0, Hout_pad - Hout), (0, 0), (0, Coutp - Cout)))
        xs_arg = xs.reshape(N, n_rt, THW, Coutp)

    wcomb = wf.astype(jnp.bfloat16)
    bcomb = bf.reshape(1, Coutp)

    # Zero-pad spatially + space-to-depth by the stride so every conv tap is a
    # contiguous static slice of the VMEM-resident block; split into halo'd
    # row tiles (halo = (kh-1)//s rows duplicated per tile).
    Hq = Hout_pad + halo_h
    Hp, Wp = s * Hq, s * Wq
    pad_b, pad_r = Hp - H - pad, Wp - W - pad
    assert pad_b >= 0 and pad_r >= 0
    xb = x_nhwc.astype(jnp.bfloat16)
    xb = jnp.pad(xb, ((0, 0), (pad, pad_b), (pad, pad_r), (0, 0)))
    xb = xb.reshape(N, Hq, s, Wq, s, Cin)
    xb = jnp.transpose(xb, (0, 2, 4, 1, 3, 5)).reshape(N, s * s, Hq, Wq, Cin)
    TH_in = TH + halo_h
    if n_rt == 1:
        xt = xb[:, None]
    else:
        xt = jnp.stack([xb[:, :, r * TH:r * TH + TH_in] for r in range(n_rt)],
                       axis=1)
    # xt: (N, n_rt, s*s, TH_in, Wq, Cin)

    x_spec = pl.BlockSpec((None, None, s * s, TH_in, Wq, Cin),
                          lambda n, r, c: (n, r, 0, 0, 0, 0))
    w_spec = pl.BlockSpec((Ktot, TCO), lambda n, r, c: (0, c))
    b_spec = pl.BlockSpec((1, TCO), lambda n, r, c: (0, c))
    out_spec = pl.BlockSpec((None, None, THW, TCO), lambda n, r, c: (n, r, 0, c))

    common = dict(kh=kh, kw=kw, stride=s, th=TH, wout=Wout, cin=Cin, relu=relu)
    if sc_mode is None:
        kernel = functools.partial(_conv_bn_act_kernel, **common)
        in_specs = [x_spec, w_spec, b_spec]
        args = [xt, wcomb, bcomb]
    elif sc_mode == "fold":
        kernel = functools.partial(_conv_bn_scfold_act_kernel, csc=Csc, **common)
        xs_spec = pl.BlockSpec((None, None, THW, Csc), lambda n, r, c: (n, r, 0, 0))
        in_specs = [x_spec, xs_spec, w_spec, b_spec]
        args = [xt, xs_arg, wcomb, bcomb]
    else:  # "add"
        kernel = functools.partial(_conv_bn_scadd_act_kernel, **common)
        xs_spec = pl.BlockSpec((None, None, THW, TCO), lambda n, r, c: (n, r, 0, c))
        in_specs = [x_spec, xs_spec, w_spec, b_spec]
        args = [xt, xs_arg, wcomb, bcomb]

    flops = 2 * N * n_rt * THW * Ktot * Coutp
    bytes_acc = int(xt.size * 2 + wcomb.size * 2 + bcomb.size * 4
                    + (xs_arg.size * 2 if xs_arg is not None else 0)
                    + N * n_rt * THW * Coutp * out_isz)

    out = pl.pallas_call(
        kernel,
        out_shape=jax.ShapeDtypeStruct((N, n_rt, THW, Coutp), out_dtype),
        grid=(N, n_rt, n_co),
        in_specs=in_specs,
        out_specs=out_spec,
        scratch_shapes=[pltpu.VMEM((THW, Ktot), jnp.bfloat16)],
        compiler_params=pltpu.CompilerParams(
            dimension_semantics=("parallel", "parallel", "parallel"),
            vmem_limit_bytes=vmem_limit),
        cost_estimate=pl.CostEstimate(flops=int(flops), transcendentals=0,
                                      bytes_accessed=bytes_acc),
    )(*args)

    out = out.reshape(N, Hout_pad, Wout, Coutp)[:, :Hout]
    return out, Coutp


# ---------------------------------------------------------------------------
# Parameters (deterministic) and BasicBlock forward
# ---------------------------------------------------------------------------

def _fold_bn(gamma, beta, mean, var, eps=1e-5):
    scale = gamma / jnp.sqrt(var + eps)
    bias = beta - mean * scale
    return scale, bias


def init_basic_block_params(key, in_planes, planes, stride):
    expansion = 1
    ks = list(jax.random.split(key, 8))

    def conv_w(k, kh, kw, cin, cout):
        fan_in = cin * kh * kw
        bound = (1.0 / fan_in) ** 0.5
        return jax.random.uniform(k, (kh, kw, cin, cout), jnp.float32, -bound, bound)

    def bn_p(k, c):
        k1, k2, k3, k4 = jax.random.split(k, 4)
        gamma = jax.random.uniform(k1, (c,), jnp.float32, 0.5, 1.5)
        beta = 0.1 * jax.random.normal(k2, (c,), jnp.float32)
        mean = 0.1 * jax.random.normal(k3, (c,), jnp.float32)
        var = jax.random.uniform(k4, (c,), jnp.float32, 0.5, 1.5)
        return (gamma, beta, mean, var)

    params = {
        "conv1_w": conv_w(ks[0], 3, 3, in_planes, planes),
        "bn1": bn_p(ks[1], planes),
        "conv2_w": conv_w(ks[2], 3, 3, planes, planes),
        "bn2": bn_p(ks[3], planes),
    }
    if stride != 1 or in_planes != expansion * planes:
        params["sc_w"] = conv_w(ks[4], 1, 1, in_planes, expansion * planes)
        params["bn_sc"] = bn_p(ks[5], expansion * planes)
    return params


def basic_block_forward(params, x_nchw, stride):
    x = jnp.transpose(x_nchw, (0, 2, 3, 1)).astype(jnp.float32)   # NCHW -> NHWC
    N, H, W, Cin = x.shape
    planes = params["conv1_w"].shape[-1]

    # conv1 + bn1 + relu (intermediate kept in bf16, lane-dense channels).
    s1, b1 = _fold_bn(*params["bn1"])
    out1, Coutp1 = _conv_bn_pallas(x, params["conv1_w"], s1, b1,
                                   stride=stride, relu=True,
                                   out_dtype=jnp.bfloat16)
    _, Hout, Wout, _ = out1.shape

    # conv2 weight: pad the input-channel dim to match out1's padded channels.
    s2, b2 = _fold_bn(*params["bn2"])
    w2 = jnp.pad(params["conv2_w"],
                 ((0, 0), (0, 0), (0, Coutp1 - planes), (0, 0)))

    if "sc_w" in params:
        # Projection shortcut (1x1 conv + BN), folded into conv2's matmul.
        ss, sb = _fold_bn(*params["bn_sc"])
        xs = x[:, ::stride, ::stride, :][:, :Hout, :Wout, :]
        wsc = params["sc_w"].reshape(Cin, planes) * ss[None, :]
        shortcut = ("fold", xs, wsc, sb)
    else:
        # Identity shortcut: direct residual add in the kernel epilogue.
        assert stride == 1 and Cin == planes
        shortcut = ("add", x)

    # conv2 + bn2 + shortcut + relu, in one fused kernel.
    out2, _ = _conv_bn_pallas(out1, w2, s2, b2, stride=1, relu=True,
                              shortcut=shortcut, out_dtype=jnp.float32)
    out = out2[..., :planes]
    return jnp.transpose(out, (0, 3, 1, 2))                        # NHWC -> NCHW


# ---------------------------------------------------------------------------
# Pure-JAX reference matching the kernel's bf16/f32 numerics
# ---------------------------------------------------------------------------

def basic_block_ref(params, x_nchw, stride):
    x = jnp.transpose(x_nchw, (0, 2, 3, 1)).astype(jnp.float32)
    s1, b1 = _fold_bn(*params["bn1"])
    w1 = (params["conv1_w"] * s1[None, None, None, :]).astype(jnp.bfloat16)
    out = jax.lax.conv_general_dilated(
        x.astype(jnp.bfloat16), w1, (stride, stride), [(1, 1), (1, 1)],
        dimension_numbers=("NHWC", "HWIO", "NHWC"),
        preferred_element_type=jnp.float32)
    out = jax.nn.relu(out + b1).astype(jnp.bfloat16)

    s2, b2 = _fold_bn(*params["bn2"])
    w2 = (params["conv2_w"] * s2[None, None, None, :]).astype(jnp.bfloat16)
    out = jax.lax.conv_general_dilated(
        out, w2, (1, 1), [(1, 1), (1, 1)],
        dimension_numbers=("NHWC", "HWIO", "NHWC"),
        preferred_element_type=jnp.float32)
    out = out + b2

    if "sc_w" in params:
        ss, sb = _fold_bn(*params["bn_sc"])
        wsc = (params["sc_w"].reshape(-1, params["sc_w"].shape[-1])
               * ss[None, :]).astype(jnp.bfloat16)
        xs = x[:, ::stride, ::stride, :].astype(jnp.bfloat16)
        short = jnp.einsum("nhwc,cd->nhwd", xs, wsc,
                           preferred_element_type=jnp.float32) + sb
    else:
        short = x.astype(jnp.bfloat16).astype(jnp.float32)
    out = jax.nn.relu(out + short)
    return jnp.transpose(out, (0, 3, 1, 2))


# ---------------------------------------------------------------------------

if __name__ == "__main__":
    key = jax.random.PRNGKey(0)
    k_x, k_p, k_x2, k_p2 = jax.random.split(key, 4)

    block_fwd = jax.jit(basic_block_forward, static_argnums=2)

    # Test 1: stride=2 with channel change -> projection (1x1 conv + BN) shortcut.
    N, in_planes, planes, H, W, stride = 2, 4, 8, 16, 16, 2
    x = jax.random.normal(k_x, (N, in_planes, H, W), jnp.float32)   # NCHW
    params = init_basic_block_params(k_p, in_planes, planes, stride)
    out = jax.block_until_ready(block_fwd(params, x, stride))
    ref = jax.block_until_ready(basic_block_ref(params, x, stride))
    assert out.shape == (N, planes, H // stride, W // stride), out.shape
    err = float(jnp.max(jnp.abs(out - ref)))
    assert jnp.allclose(out, ref, atol=3e-2, rtol=3e-2), err

    # Test 2: stride=1, in_planes == planes -> identity shortcut path.
    N2, planes2, H2 = 2, 8, 8
    x2 = jax.random.normal(k_x2, (N2, planes2, H2, H2), jnp.float32)
    params2 = init_basic_block_params(k_p2, planes2, planes2, 1)
    out2 = jax.block_until_ready(block_fwd(params2, x2, 1))
    ref2 = jax.block_until_ready(basic_block_ref(params2, x2, 1))
    assert out2.shape == (N2, planes2, H2, H2), out2.shape
    err2 = float(jnp.max(jnp.abs(out2 - ref2)))
    assert jnp.allclose(out2, ref2, atol=3e-2, rtol=3e-2), err2

    print("KERNEL_OK")
</pallas_src>

<mosaic_0001>
module attributes {stable_mosaic.version = 11 : i64} {
  func.func @_conv_bn_act_kernel(%arg0: i32, %arg1: i32, %arg2: i32, %arg3: memref<1x1x4x9x9x4xbf16, #tpu.memory_space<vmem>>, %arg4: memref<36x128xbf16, #tpu.memory_space<vmem>>, %arg5: memref<1x128xf32, #tpu.memory_space<vmem>>, %arg6: memref<1x1x64x128xbf16, #tpu.memory_space<vmem>>, %arg7: memref<64x36xbf16, #tpu.memory_space<vmem>>) attributes {dimension_semantics = [#tpu.dimension_semantics<parallel>, #tpu.dimension_semantics<parallel>, #tpu.dimension_semantics<parallel>], iteration_bounds = array<i64: 2, 1, 1>, scalar_prefetch = 0 : i64, scratch_operands = 1 : i64, tpu.core_type = #tpu.core_type<tc>, window_params = [{transform_indices = @transform_0, window_bounds = array<i64: 1, 1, 4, 9, 9, 4>}, {transform_indices = @transform_1, window_bounds = array<i64: 36, 128>}, {transform_indices = @transform_2, window_bounds = array<i64: 1, 128>}, {transform_indices = @transform_3, window_bounds = array<i64: 1, 1, 64, 128>}]} {
    %c0 = arith.constant 0 : index
    %c0_0 = arith.constant 0 : index
    %c0_1 = arith.constant 0 : index
    %c0_2 = arith.constant 0 : index
    %c0_3 = arith.constant 0 : index
    %c0_4 = arith.constant 0 : index
    %0 = vector.load %arg3[%c0, %c0_0, %c0_1, %c0_2, %c0_3, %c0_4] : memref<1x1x4x9x9x4xbf16, #tpu.memory_space<vmem>>, vector<1x1x1x8x8x4xbf16>
    %1 = vector.shape_cast %0 : vector<1x1x1x8x8x4xbf16> to vector<8x8x4xbf16>
    %2 = vector.shape_cast %1 : vector<8x8x4xbf16> to vector<64x4xbf16>
    %c0_5 = arith.constant 0 : index
    %c0_6 = arith.constant 0 : index
    %3 = vector.load %arg7[%c0_5, %c0_6] : memref<64x36xbf16, #tpu.memory_space<vmem>>, vector<64x4xbf16>
    tpu.vector_store %arg7[%c0_5, %c0_6], %2 {strides = array<i32>} : memref<64x36xbf16, #tpu.memory_space<vmem>>, vector<64x4xbf16>,
    %c0_7 = arith.constant 0 : index
    %c0_8 = arith.constant 0 : index
    %c1 = arith.constant 1 : index
    %c0_9 = arith.constant 0 : index
    %c0_10 = arith.constant 0 : index
    %c0_11 = arith.constant 0 : index
    %4 = vector.load %arg3[%c0_7, %c0_8, %c1, %c0_9, %c0_10, %c0_11] : memref<1x1x4x9x9x4xbf16, #tpu.memory_space<vmem>>, vector<1x1x1x8x8x4xbf16>
    %5 = vector.shape_cast %4 : vector<1x1x1x8x8x4xbf16> to vector<8x8x4xbf16>
    %6 = vector.shape_cast %5 : vector<8x8x4xbf16> to vector<64x4xbf16>
    %c0_12 = arith.constant 0 : index
    %c4 = arith.constant 4 : index
    %7 = vector.load %arg7[%c0_12, %c4] : memref<64x36xbf16, #tpu.memory_space<vmem>>, vector<64x4xbf16>
    tpu.vector_store %arg7[%c0_12, %c4], %6 {strides = array<i32>} : memref<64x36xbf16, #tpu.memory_space<vmem>>, vector<64x4xbf16>,
    %c0_13 = arith.constant 0 : index
    %c0_14 = arith.constant 0 : index
    %c0_15 = arith.constant 0 : index
    %c0_16 = arith.constant 0 : index
    %c1_17 = arith.constant 1 : index
    %c0_18 = arith.constant 0 : index
    %8 = vector.load %arg3[%c0_13, %c0_14, %c0_15, %c0_16, %c1_17, %c0_18] : memref<1x1x4x9x9x4xbf16, #tpu.memory_space<vmem>>, vector<1x1x1x8x8x4xbf16>
    %9 = vector.shape_cast %8 : vector<1x1x1x8x8x4xbf16> to vector<8x8x4xbf16>
    %10 = vector.shape_cast %9 : vector<8x8x4xbf16> to vector<64x4xbf16>
    %c0_19 = arith.constant 0 : index
    %c8 = arith.constant 8 : index
    %11 = vector.load %arg7[%c0_19, %c8] : memref<64x36xbf16, #tpu.memory_space<vmem>>, vector<64x4xbf16>
    tpu.vector_store %arg7[%c0_19, %c8], %10 {strides = array<i32>} : memref<64x36xbf16, #tpu.memory_space<vmem>>, vector<64x4xbf16>,
    %c0_20 = arith.constant 0 : index
    %c0_21 = arith.constant 0 : index
    %c2 = arith.constant 2 : index
    %c0_22 = arith.constant 0 : index
    %c0_23 = arith.constant 0 : index
    %c0_24 = arith.constant 0 : index
    %12 = vector.load %arg3[%c0_20, %c0_21, %c2, %c0_22, %c0_23, %c0_24] : memref<1x1x4x9x9x4xbf16, #tpu.memory_space<vmem>>, vector<1x1x1x8x8x4xbf16>
    %13 = vector.shape_cast %12 : vector<1x1x1x8x8x4xbf16> to vector<8x8x4xbf16>
    %14 = vector.shape_cast %13 : vector<8x8x4xbf16> to vector<64x4xbf16>
    %c0_25 = arith.constant 0 : index
    %c12 = arith.constant 12 : index
    %15 = vector.load %arg7[%c0_25, %c12] : memref<64x36xbf16, #tpu.memory_space<vmem>>, vector<64x4xbf16>
    tpu.vector_store %arg7[%c0_25, %c12], %14 {strides = array<i32>} : memref<64x36xbf16, #tpu.memory_space<vmem>>, vector<64x4xbf16>,
    %c0_26 = arith.constant 0 : index
    %c0_27 = arith.constant 0 : index
    %c3 = arith.constant 3 : index
    %c0_28 = arith.constant 0 : index
    %c0_29 = arith.constant 0 : index
    %c0_30 = arith.constant 0 : index
    %16 = vector.load %arg3[%c0_26, %c0_27, %c3, %c0_28, %c0_29, %c0_30] : memref<1x1x4x9x9x4xbf16, #tpu.memory_space<vmem>>, vector<1x1x1x8x8x4xbf16>
    %17 = vector.shape_cast %16 : vector<1x1x1x8x8x4xbf16> to vector<8x8x4xbf16>
    %18 = vector.shape_cast %17 : vector<8x8x4xbf16> to vector<64x4xbf16>
    %c0_31 = arith.constant 0 : index
    %c16 = arith.constant 16 : index
    %19 = vector.load %arg7[%c0_31, %c16] : memref<64x36xbf16, #tpu.memory_space<vmem>>, vector<64x4xbf16>
    tpu.vector_store %arg7[%c0_31, %c16], %18 {strides = array<i32>} : memref<64x36xbf16, #tpu.memory_space<vmem>>, vector<64x4xbf16>,
    %c0_32 = arith.constant 0 : index
    %c0_33 = arith.constant 0 : index
    %c2_34 = arith.constant 2 : index
    %c0_35 = arith.constant 0 : index
    %c1_36 = arith.constant 1 : index
    %c0_37 = arith.constant 0 : index
    %20 = vector.load %arg3[%c0_32, %c0_33, %c2_34, %c0_35, %c1_36, %c0_37] : memref<1x1x4x9x9x4xbf16, #tpu.memory_space<vmem>>, vector<1x1x1x8x8x4xbf16>
    %21 = vector.shape_cast %20 : vector<1x1x1x8x8x4xbf16> to vector<8x8x4xbf16>
    %22 = vector.shape_cast %21 : vector<8x8x4xbf16> to vector<64x4xbf16>
    %c0_38 = arith.constant 0 : index
    %c20 = arith.constant 20 : index
    %23 = vector.load %arg7[%c0_38, %c20] : memref<64x36xbf16, #tpu.memory_space<vmem>>, vector<64x4xbf16>
    tpu.vector_store %arg7[%c0_38, %c20], %22 {strides = array<i32>} : memref<64x36xbf16, #tpu.memory_space<vmem>>, vector<64x4xbf16>,
    %c0_39 = arith.constant 0 : index
    %c0_40 = arith.constant 0 : index
    %c0_41 = arith.constant 0 : index
    %c1_42 = arith.constant 1 : index
    %c0_43 = arith.constant 0 : index
    %c0_44 = arith.constant 0 : index
    %24 = vector.load %arg3[%c0_39, %c0_40, %c0_41, %c1_42, %c0_43, %c0_44] : memref<1x1x4x9x9x4xbf16, #tpu.memory_space<vmem>>, vector<1x1x1x8x8x4xbf16>
    %25 = vector.shape_cast %24 : vector<1x1x1x8x8x4xbf16> to vector<8x8x4xbf16>
    %26 = vector.shape_cast %25 : vector<8x8x4xbf16> to vector<64x4xbf16>
    %c0_45 = arith.constant 0 : index
    %c24 = arith.constant 24 : index
    %27 = vector.load %arg7[%c0_45, %c24] : memref<64x36xbf16, #tpu.memory_space<vmem>>, vector<64x4xbf16>
    tpu.vector_store %arg7[%c0_45, %c24], %26 {strides = array<i32>} : memref<64x36xbf16, #tpu.memory_space<vmem>>, vector<64x4xbf16>,
    %c0_46 = arith.constant 0 : index
    %c0_47 = arith.constant 0 : index
    %c1_48 = arith.constant 1 : index
    %c1_49 = arith.constant 1 : index
    %c0_50 = arith.constant 0 : index
    %c0_51 = arith.constant 0 : index
    %28 = vector.load %arg3[%c0_46, %c0_47, %c1_48, %c1_49, %c0_50, %c0_51] : memref<1x1x4x9x9x4xbf16, #tpu.memory_space<vmem>>, vector<1x1x1x8x8x4xbf16>
    %29 = vector.shape_cast %28 : vector<1x1x1x8x8x4xbf16> to vector<8x8x4xbf16>
    %30 = vector.shape_cast %29 : vector<8x8x4xbf16> to vector<64x4xbf16>
    %c0_52 = arith.constant 0 : index
    %c28 = arith.constant 28 : index
    %31 = vector.load %arg7[%c0_52, %c28] : memref<64x36xbf16, #tpu.memory_space<vmem>>, vector<64x4xbf16>
    tpu.vector_store %arg7[%c0_52, %c28], %30 {strides = array<i32>} : memref<64x36xbf16, #tpu.memory_space<vmem>>, vector<64x4xbf16>,
    %c0_53 = arith.constant 0 : index
    %c0_54 = arith.constant 0 : index
    %c0_55 = arith.constant 0 : index
    %c1_56 = arith.constant 1 : index
    %c1_57 = arith.constant 1 : index
    %c0_58 = arith.constant 0 : index
    %32 = vector.load %arg3[%c0_53, %c0_54, %c0_55, %c1_56, %c1_57, %c0_58] : memref<1x1x4x9x9x4xbf16, #tpu.memory_space<vmem>>, vector<1x1x1x8x8x4xbf16>
    %33 = vector.shape_cast %32 : vector<1x1x1x8x8x4xbf16> to vector<8x8x4xbf16>
    %34 = vector.shape_cast %33 : vector<8x8x4xbf16> to vector<64x4xbf16>
    %c0_59 = arith.constant 0 : index
    %c32 = arith.constant 32 : index
    %35 = vector.load %arg7[%c0_59, %c32] : memref<64x36xbf16, #tpu.memory_space<vmem>>, vector<64x4xbf16>
    tpu.vector_store %arg7[%c0_59, %c32], %34 {strides = array<i32>} : memref<64x36xbf16, #tpu.memory_space<vmem>>, vector<64x4xbf16>,
    %c0_60 = arith.constant 0 : index
    %c0_61 = arith.constant 0 : index
    %36 = vector.load %arg7[%c0_60, %c0_61] : memref<64x36xbf16, #tpu.memory_space<vmem>>, vector<64x36xbf16>
    %c0_62 = arith.constant 0 : index
    %c0_63 = arith.constant 0 : index
    %37 = vector.load %arg4[%c0_62, %c0_63] : memref<36x128xbf16, #tpu.memory_space<vmem>>, vector<36x128xbf16>
    %cst = arith.constant dense<0.000000e+00> : vector<64x128xf32>
    %38 = tpu.matmul %36, %37, %cst {dimension_numbers = #tpu.dot_dimension_numbers<[1], [0], [0], [1], [0, 0, 1, 1], [], []>} : vector<64x36xbf16>, vector<36x128xbf16>, vector<64x128xf32> -> vector<64x128xf32>
    %c0_64 = arith.constant 0 : index
    %c0_65 = arith.constant 0 : index
    %39 = vector.load %arg5[%c0_64, %c0_65] : memref<1x128xf32, #tpu.memory_space<vmem>>, vector<1x128xf32>
    %40 = vector.broadcast %39 : vector<1x128xf32> to vector<64x128xf32>
    %41 = arith.addf %38, %40 : vector<64x128xf32>
    %cst_66 = arith.constant 0.000000e+00 : f32
    %42 = vector.broadcast %cst_66 : f32 to vector<64x128xf32>
    %43 = arith.maximumf %41, %42 : vector<64x128xf32>
    %44 = arith.truncf %43 : vector<64x128xf32> to vector<64x128xbf16>
    %c0_67 = arith.constant 0 : index
    %c0_68 = arith.constant 0 : index
    %c0_69 = arith.constant 0 : index
    %c0_70 = arith.constant 0 : index
    %45 = vector.load %arg6[%c0_67, %c0_68, %c0_69, %c0_70] : memref<1x1x64x128xbf16, #tpu.memory_space<vmem>>, vector<1x1x64x128xbf16>
    %46 = vector.shape_cast %45 : vector<1x1x64x128xbf16> to vector<64x128xbf16>
    %47 = vector.shape_cast %44 : vector<64x128xbf16> to vector<1x1x64x128xbf16>
    tpu.vector_store %arg6[%c0_67, %c0_68, %c0_69, %c0_70], %47 {strides = array<i32>} : memref<1x1x64x128xbf16, #tpu.memory_space<vmem>>, vector<1x1x64x128xbf16>,
    return
  }
  func.func @transform_0(%arg0: i32, %arg1: i32, %arg2: i32) -> (i32, i32, i32, i32, i32, i32) {
    %c0_i32 = arith.constant 0 : i32
    %c0_i32_0 = arith.constant 0 : i32
    %c0_i32_1 = arith.constant 0 : i32
    %c0_i32_2 = arith.constant 0 : i32
    %c0_i32_3 = arith.constant 0 : i32
    return %arg0, %arg1, %c0_i32, %c0_i32_0, %c0_i32_1, %c0_i32_2 : i32, i32, i32, i32, i32, i32
  }
  func.func @transform_1(%arg0: i32, %arg1: i32, %arg2: i32) -> (i32, i32) {
    %c0_i32 = arith.constant 0 : i32
    %c0_i32_0 = arith.constant 0 : i32
    return %c0_i32, %arg2 : i32, i32
  }
  func.func @transform_2(%arg0: i32, %arg1: i32, %arg2: i32) -> (i32, i32) {
    %c0_i32 = arith.constant 0 : i32
    %c0_i32_0 = arith.constant 0 : i32
    return %c0_i32, %arg2 : i32, i32
  }
  func.func @transform_3(%arg0: i32, %arg1: i32, %arg2: i32) -> (i32, i32, i32, i32) {
    %c0_i32 = arith.constant 0 : i32
    %c0_i32_0 = arith.constant 0 : i32
    return %arg0, %arg1, %c0_i32, %arg2 : i32, i32, i32, i32
  }
}

module attributes {stable_mosaic.version = 11 : i64} {
  func.func @_conv_bn_scfold_act_kernel(%arg0: i32, %arg1: i32, %arg2: i32, %arg3: memref<1x1x1x10x10x128xbf16, #tpu.memory_space<vmem>>, %arg4: memref<1x1x64x4xbf16, #tpu.memory_space<vmem>>, %arg5: memref<1156x128xbf16, #tpu.memory_space<vmem>>, %arg6: memref<1x128xf32, #tpu.memory_space<vmem>>, %arg7: memref<1x1x64x128xf32, #tpu.memory_space<vmem>>, %arg8: memref<64x1156xbf16, #tpu.memory_space<vmem>>) attributes {dimension_semantics = [#tpu.dimension_semantics<parallel>, #tpu.dimension_semantics<parallel>, #tpu.dimension_semantics<parallel>], iteration_bounds = array<i64: 2, 1, 1>, scalar_prefetch = 0 : i64, scratch_operands = 1 : i64, tpu.core_type = #tpu.core_type<tc>, window_params = [{transform_indices = @transform_0, window_bounds = array<i64: 1, 1, 1, 10, 10, 128>}, {transform_indices = @transform_1, window_bounds = array<i64: 1, 1, 64, 4>}, {transform_indices = @transform_2, window_bounds = array<i64: 1156, 128>}, {transform_indices = @transform_3, window_bounds = array<i64: 1, 128>}, {transform_indices = @transform_4, window_bounds = array<i64: 1, 1, 64, 128>}]} {
    %c0 = arith.constant 0 : index
    %c0_0 = arith.constant 0 : index
    %c0_1 = arith.constant 0 : index
    %c0_2 = arith.constant 0 : index
    %c0_3 = arith.constant 0 : index
    %c0_4 = arith.constant 0 : index
    %0 = vector.load %arg3[%c0, %c0_0, %c0_1, %c0_2, %c0_3, %c0_4] : memref<1x1x1x10x10x128xbf16, #tpu.memory_space<vmem>>, vector<1x1x1x8x8x128xbf16>
    %1 = vector.shape_cast %0 : vector<1x1x1x8x8x128xbf16> to vector<8x8x128xbf16>
    %2 = vector.shape_cast %1 : vector<8x8x128xbf16> to vector<64x128xbf16>
    %c0_5 = arith.constant 0 : index
    %c0_6 = arith.constant 0 : index
    %3 = vector.load %arg8[%c0_5, %c0_6] : memref<64x1156xbf16, #tpu.memory_space<vmem>>, vector<64x128xbf16>
    tpu.vector_store %arg8[%c0_5, %c0_6], %2 {strides = array<i32>} : memref<64x1156xbf16, #tpu.memory_space<vmem>>, vector<64x128xbf16>,
    %c0_7 = arith.constant 0 : index
    %c0_8 = arith.constant 0 : index
    %c0_9 = arith.constant 0 : index
    %c0_10 = arith.constant 0 : index
    %c1 = arith.constant 1 : index
    %c0_11 = arith.constant 0 : index
    %4 = vector.load %arg3[%c0_7, %c0_8, %c0_9, %c0_10, %c1, %c0_11] : memref<1x1x1x10x10x128xbf16, #tpu.memory_space<vmem>>, vector<1x1x1x8x8x128xbf16>
    %5 = vector.shape_cast %4 : vector<1x1x1x8x8x128xbf16> to vector<8x8x128xbf16>
    %6 = vector.shape_cast %5 : vector<8x8x128xbf16> to vector<64x128xbf16>
    %c0_12 = arith.constant 0 : index
    %c128 = arith.constant 128 : index
    %7 = vector.load %arg8[%c0_12, %c128] : memref<64x1156xbf16, #tpu.memory_space<vmem>>, vector<64x128xbf16>
    tpu.vector_store %arg8[%c0_12, %c128], %6 {strides = array<i32>} : memref<64x1156xbf16, #tpu.memory_space<vmem>>, vector<64x128xbf16>,
    %c0_13 = arith.constant 0 : index
    %c0_14 = arith.constant 0 : index
    %c0_15 = arith.constant 0 : index
    %c0_16 = arith.constant 0 : index
    %c2 = arith.constant 2 : index
    %c0_17 = arith.constant 0 : index
    %8 = vector.load %arg3[%c0_13, %c0_14, %c0_15, %c0_16, %c2, %c0_17] : memref<1x1x1x10x10x128xbf16, #tpu.memory_space<vmem>>, vector<1x1x1x8x8x128xbf16>
    %9 = vector.shape_cast %8 : vector<1x1x1x8x8x128xbf16> to vector<8x8x128xbf16>
    %10 = vector.shape_cast %9 : vector<8x8x128xbf16> to vector<64x128xbf16>
    %c0_18 = arith.constant 0 : index
    %c256 = arith.constant 256 : index
    %11 = vector.load %arg8[%c0_18, %c256] : memref<64x1156xbf16, #tpu.memory_space<vmem>>, vector<64x128xbf16>
    tpu.vector_store %arg8[%c0_18, %c256], %10 {strides = array<i32>} : memref<64x1156xbf16, #tpu.memory_space<vmem>>, vector<64x128xbf16>,
    %c0_19 = arith.constant 0 : index
    %c0_20 = arith.constant 0 : index
    %c0_21 = arith.constant 0 : index
    %c1_22 = arith.constant 1 : index
    %c0_23 = arith.constant 0 : index
    %c0_24 = arith.constant 0 : index
    %12 = vector.load %arg3[%c0_19, %c0_20, %c0_21, %c1_22, %c0_23, %c0_24] : memref<1x1x1x10x10x128xbf16, #tpu.memory_space<vmem>>, vector<1x1x1x8x8x128xbf16>
    %13 = vector.shape_cast %12 : vector<1x1x1x8x8x128xbf16> to vector<8x8x128xbf16>
    %14 = vector.shape_cast %13 : vector<8x8x128xbf16> to vector<64x128xbf16>
    %c0_25 = arith.constant 0 : index
    %c384 = arith.constant 384 : index
    %15 = vector.load %arg8[%c0_25, %c384] : memref<64x1156xbf16, #tpu.memory_space<vmem>>, vector<64x128xbf16>
    tpu.vector_store %arg8[%c0_25, %c384], %14 {strides = array<i32>} : memref<64x1156xbf16, #tpu.memory_space<vmem>>, vector<64x128xbf16>,
    %c0_26 = arith.constant 0 : index
    %c0_27 = arith.constant 0 : index
    %c0_28 = arith.constant 0 : index
    %c1_29 = arith.constant 1 : index
    %c1_30 = arith.constant 1 : index
    %c0_31 = arith.constant 0 : index
    %16 = vector.load %arg3[%c0_26, %c0_27, %c0_28, %c1_29, %c1_30, %c0_31] : memref<1x1x1x10x10x128xbf16, #tpu.memory_space<vmem>>, vector<1x1x1x8x8x128xbf16>
    %17 = vector.shape_cast %16 : vector<1x1x1x8x8x128xbf16> to vector<8x8x128xbf16>
    %18 = vector.shape_cast %17 : vector<8x8x128xbf16> to vector<64x128xbf16>
    %c0_32 = arith.constant 0 : index
    %c512 = arith.constant 512 : index
    %19 = vector.load %arg8[%c0_32, %c512] : memref<64x1156xbf16, #tpu.memory_space<vmem>>, vector<64x128xbf16>
    tpu.vector_store %arg8[%c0_32, %c512], %18 {strides = array<i32>} : memref<64x1156xbf16, #tpu.memory_space<vmem>>, vector<64x128xbf16>,
    %c0_33 = arith.constant 0 : index
    %c0_34 = arith.constant 0 : index
    %c0_35 = arith.constant 0 : index
    %c1_36 = arith.constant 1 : index
    %c2_37 = arith.constant 2 : index
    %c0_38 = arith.constant 0 : index
    %20 = vector.load %arg3[%c0_33, %c0_34, %c0_35, %c1_36, %c2_37, %c0_38] : memref<1x1x1x10x10x128xbf16, #tpu.memory_space<vmem>>, vector<1x1x1x8x8x128xbf16>
    %21 = vector.shape_cast %20 : vector<1x1x1x8x8x128xbf16> to vector<8x8x128xbf16>
    %22 = vector.shape_cast %21 : vector<8x8x128xbf16> to vector<64x128xbf16>
    %c0_39 = arith.constant 0 : index
    %c640 = arith.constant 640 : index
    %23 = vector.load %arg8[%c0_39, %c640] : memref<64x1156xbf16, #tpu.memory_space<vmem>>, vector<64x128xbf16>
    tpu.vector_store %arg8[%c0_39, %c640], %22 {strides = array<i32>} : memref<64x1156xbf16, #tpu.memory_space<vmem>>, vector<64x128xbf16>,
    %c0_40 = arith.constant 0 : index
    %c0_41 = arith.constant 0 : index
    %c0_42 = arith.constant 0 : index
    %c2_43 = arith.constant 2 : index
    %c0_44 = arith.constant 0 : index
    %c0_45 = arith.constant 0 : index
    %24 = vector.load %arg3[%c0_40, %c0_41, %c0_42, %c2_43, %c0_44, %c0_45] : memref<1x1x1x10x10x128xbf16, #tpu.memory_space<vmem>>, vector<1x1x1x8x8x128xbf16>
    %25 = vector.shape_cast %24 : vector<1x1x1x8x8x128xbf16> to vector<8x8x128xbf16>
    %26 = vector.shape_cast %25 : vector<8x8x128xbf16> to vector<64x128xbf16>
    %c0_46 = arith.constant 0 : index
    %c768 = arith.constant 768 : index
    %27 = vector.load %arg8[%c0_46, %c768] : memref<64x1156xbf16, #tpu.memory_space<vmem>>, vector<64x128xbf16>
    tpu.vector_store %arg8[%c0_46, %c768], %26 {strides = array<i32>} : memref<64x1156xbf16, #tpu.memory_space<vmem>>, vector<64x128xbf16>,
    %c0_47 = arith.constant 0 : index
    %c0_48 = arith.constant 0 : index
    %c0_49 = arith.constant 0 : index
    %c2_50 = arith.constant 2 : index
    %c1_51 = arith.constant 1 : index
    %c0_52 = arith.constant 0 : index
    %28 = vector.load %arg3[%c0_47, %c0_48, %c0_49, %c2_50, %c1_51, %c0_52] : memref<1x1x1x10x10x128xbf16, #tpu.memory_space<vmem>>, vector<1x1x1x8x8x128xbf16>
    %29 = vector.shape_cast %28 : vector<1x1x1x8x8x128xbf16> to vector<8x8x128xbf16>
    %30 = vector.shape_cast %29 : vector<8x8x128xbf16> to vector<64x128xbf16>
    %c0_53 = arith.constant 0 : index
    %c896 = arith.constant 896 : index
    %31 = vector.load %arg8[%c0_53, %c896] : memref<64x1156xbf16, #tpu.memory_space<vmem>>, vector<64x128xbf16>
    tpu.vector_store %arg8[%c0_53, %c896], %30 {strides = array<i32>} : memref<64x1156xbf16, #tpu.memory_space<vmem>>, vector<64x128xbf16>,
    %c0_54 = arith.constant 0 : index
    %c0_55 = arith.constant 0 : index
    %c0_56 = arith.constant 0 : index
    %c2_57 = arith.constant 2 : index
    %c2_58 = arith.constant 2 : index
    %c0_59 = arith.constant 0 : index
    %32 = vector.load %arg3[%c0_54, %c0_55, %c0_56, %c2_57, %c2_58, %c0_59] : memref<1x1x1x10x10x128xbf16, #tpu.memory_space<vmem>>, vector<1x1x1x8x8x128xbf16>
    %33 = vector.shape_cast %32 : vector<1x1x1x8x8x128xbf16> to vector<8x8x128xbf16>
    %34 = vector.shape_cast %33 : vector<8x8x128xbf16> to vector<64x128xbf16>
    %c0_60 = arith.constant 0 : index
    %c1024 = arith.constant 1024 : index
    %35 = vector.load %arg8[%c0_60, %c1024] : memref<64x1156xbf16, #tpu.memory_space<vmem>>, vector<64x128xbf16>
    tpu.vector_store %arg8[%c0_60, %c1024], %34 {strides = array<i32>} : memref<64x1156xbf16, #tpu.memory_space<vmem>>, vector<64x128xbf16>,
    %c0_61 = arith.constant 0 : index
    %c0_62 = arith.constant 0 : index
    %c0_63 = arith.constant 0 : index
    %c0_64 = arith.constant 0 : index
    %36 = vector.load %arg4[%c0_61, %c0_62, %c0_63, %c0_64] : memref<1x1x64x4xbf16, #tpu.memory_space<vmem>>, vector<1x1x64x4xbf16>
    %37 = vector.shape_cast %36 : vector<1x1x64x4xbf16> to vector<64x4xbf16>
    %c0_65 = arith.constant 0 : index
    %c1152 = arith.constant 1152 : index
    %38 = vector.load %arg8[%c0_65, %c1152] : memref<64x1156xbf16, #tpu.memory_space<vmem>>, vector<64x4xbf16>
    tpu.vector_store %arg8[%c0_65, %c1152], %37 {strides = array<i32>} : memref<64x1156xbf16, #tpu.memory_space<vmem>>, vector<64x4xbf16>,
    %c0_66 = arith.constant 0 : index
    %c0_67 = arith.constant 0 : index
    %39 = vector.load %arg8[%c0_66, %c0_67] : memref<64x1156xbf16, #tpu.memory_space<vmem>>, vector<64x1156xbf16>
    %c0_68 = arith.constant 0 : index
    %c0_69 = arith.constant 0 : index
    %40 = vector.load %arg5[%c0_68, %c0_69] : memref<1156x128xbf16, #tpu.memory_space<vmem>>, vector<1156x128xbf16>
    %cst = arith.constant dense<0.000000e+00> : vector<64x128xf32>
    %41 = tpu.matmul %39, %40, %cst {dimension_numbers = #tpu.dot_dimension_numbers<[1], [0], [0], [1], [0, 0, 1, 1], [], []>} : vector<64x1156xbf16>, vector<1156x128xbf16>, vector<64x128xf32> -> vector<64x128xf32>
    %c0_70 = arith.constant 0 : index
    %c0_71 = arith.constant 0 : index
    %42 = vector.load %arg6[%c0_70, %c0_71] : memref<1x128xf32, #tpu.memory_space<vmem>>, vector<1x128xf32>
    %43 = vector.broadcast %42 : vector<1x128xf32> to vector<64x128xf32>
    %44 = arith.addf %41, %43 : vector<64x128xf32>
    %cst_72 = arith.constant 0.000000e+00 : f32
    %45 = vector.broadcast %cst_72 : f32 to vector<64x128xf32>
    %46 = arith.maximumf %44, %45 : vector<64x128xf32>
    %c0_73 = arith.constant 0 : index
    %c0_74 = arith.constant 0 : index
    %c0_75 = arith.constant 0 : index
    %c0_76 = arith.constant 0 : index
    %47 = vector.load %arg7[%c0_73, %c0_74, %c0_75, %c0_76] : memref<1x1x64x128xf32, #tpu.memory_space<vmem>>, vector<1x1x64x128xf32>
    %48 = vector.shape_cast %47 : vector<1x1x64x128xf32> to vector<64x128xf32>
    %49 = vector.shape_cast %46 : vector<64x128xf32> to vector<1x1x64x128xf32>
    tpu.vector_store %arg7[%c0_73, %c0_74, %c0_75, %c0_76], %49 {strides = array<i32>} : memref<1x1x64x128xf32, #tpu.memory_space<vmem>>, vector<1x1x64x128xf32>,
    return
  }
  func.func @transform_0(%arg0: i32, %arg1: i32, %arg2: i32) -> (i32, i32, i32, i32, i32, i32) {
    %c0_i32 = arith.constant 0 : i32
    %c0_i32_0 = arith.constant 0 : i32
    %c0_i32_1 = arith.constant 0 : i32
    %c0_i32_2 = arith.constant 0 : i32
    %c0_i32_3 = arith.constant 0 : i32
    return %arg0, %arg1, %c0_i32, %c0_i32_0, %c0_i32_1, %c0_i32_2 : i32, i32, i32, i32, i32, i32
  }
  func.func @transform_1(%arg0: i32, %arg1: i32, %arg2: i32) -> (i32, i32, i32, i32) {
    %c0_i32 = arith.constant 0 : i32
    %c0_i32_0 = arith.constant 0 : i32
    %c0_i32_1 = arith.constant 0 : i32
    return %arg0, %arg1, %c0_i32, %c0_i32_0 : i32, i32, i32, i32
  }
  func.func @transform_2(%arg0: i32, %arg1: i32, %arg2: i32) -> (i32, i32) {
    %c0_i32 = arith.constant 0 : i32
    %c0_i32_0 = arith.constant 0 : i32
    return %c0_i32, %arg2 : i32, i32
  }
  func.func @transform_3(%arg0: i32, %arg1: i32, %arg2: i32) -> (i32, i32) {
    %c0_i32 = arith.constant 0 : i32
    %c0_i32_0 = arith.constant 0 : i32
    return %c0_i32, %arg2 : i32, i32
  }
  func.func @transform_4(%arg0: i32, %arg1: i32, %arg2: i32) -> (i32, i32, i32, i32) {
    %c0_i32 = arith.constant 0 : i32
    %c0_i32_0 = arith.constant 0 : i32
    return %arg0, %arg1, %c0_i32, %arg2 : i32, i32, i32, i32
  }
}

</mosaic_0001>

<bundles_post_ra>
// kernel: basic_block_forward.2
= control target key start
LH: loop header
LB: loop body
LE: loop exit
PB: predicated region body
PF: predicated region fallthrough
CT: control target
= control target key end

     0   :  { %s1582_s12 = smov 0   ;;  %s1584_s13 = smov 0   ;;  %s2063_s0 = inlined_call_operand.vmem [shape: bf16[2,1,4,9,9,4], index: 0, kind: input, shape index: {}]   ;;  %s2064_s1 = inlined_call_operand.vmem [shape: bf16[36,128], index: 1, kind: input, shape index: {}]   ;;  %s2065_s2 = inlined_call_operand.vmem [shape: f32[1,128], index: 2, kind: input, shape index: {}]   ;;  %s2066_s3 = inlined_call_operand.vmem [shape: bf16[2,1,64,128], index: 3, kind: output, shape index: {}]  }
   0x1   :  { %s1586_s14 = smov 0  }
   0x2 LB: > { %s32_s15 = sadd.s32 1, %s1548_s13  ;;  %p1331_p0 = scmp.ge.s32.totalorder %s1552_s14, 1  ;;  %s1552_s14 = sphi %s1586_s14, %s13_s14   ;;  %s1548_s13 = sphi %s1584_s13, %s2070_s13   ;;  %s1544_s12 = sphi %s1582_s12, %s2069_s12  }
   0x3   : > { %p34_p1 = scmp.ge.s32.totalorder %s32_s15, 2  ;;  %p183_p2 = scmp.lt.s32.totalorder %s1552_s14, 3 }
   0x5   : > { %s2072_s15 = smov (%p34_p1, %s32_s15), 0  ;;  %p184_p3 = pnand %p1331_p0, %p183_p2 }
   0x6   : > { %p225_p4 = scmp.lt.s32.totalorder (!%p184_p3), %s1544_s12, 1  ;;  %s1554_s20 = smov (!%p184_p3), 4  }
   0x7   : > { %187 = sbr.rel (%p184_p3) target bundleno = 471 (0x1d7), region = 32  ;;  %s1555_s21 = smov (!%p184_p3), 8  }
   0x8   : > { %s1556_s22 = smov (!%p184_p3), 12   ;;  %s1557_s23 = smov (!%p184_p3), 16  }
   0x9   : > { %s1558_s24 = smov (!%p184_p3), 20   ;;  %s1559_s25 = smov (!%p184_p3), 24  }
   0xa   : > { %s1560_s26 = smov (!%p184_p3), 28   ;;  %s1561_s6 = smov (!%p184_p3), 32  }
   0xc   : > { %s2074_s12 = smov (!%p225_p4, %s1544_s12), 1  ;;  %vm337_vm0 = vsmask.f32 3328  ;;  %vm338_vm1 = vsmask.f32 7440  ;;  %vm262_vm3 = vcmask 27648  }
   0xd   : > { %s1490_s16 = smul.u32 288, %s2074_s12  ;;  %vm1633_vm2 = vmor %vm337_vm0, %vm338_vm1  ;;  %vm1075_vm4 = vcmask 1041408   ;;  %vm312_vm5 = vcmask 60448   ;;  %vm476_vm6 = vcmask 93248   ;;  %vm526_vm7 = vcmask 126048   ;;  %s1429_s9 = sshll.u32 %s2074_s12, 5 }
   0xe   : > { %vm576_vm8 = vcmask 158848   ;;  %vm737_vm9 = vcmask 191648   ;;  %vm787_vm10 = vcmask 224448   ;;  %vm837_vm11 = vcmask 257248  }
   0xf   : > { %s1606_s19 = scalar_lea.vmem %s2063_s0, %s1490_s16  ;;  %vm998_vm12 = vcmask 290048   ;;  %vm1062_vm13 = vcmask 293888   ;;  %s252_s16 = scalar_lea.vmem %s2066_s3, %s1429_s9 }
  0x10   : > { %v1339_v0 = vld [vmem:[%s1606_s19 + $0x68] sm:$0xf]  ;;  %v1340_v2 = vld [vmem:[%s1606_s19 + $0x70] sm:$0xf]  ;;  %v324_v5 = vld [vmem:[%s1606_s19 + $0xc] sm:$0x1] }
  0x11   : > { %v1335_v1 = vld [vmem:[%s1606_s19 + $0x48] sm:$0xf]  ;;  %296 = vrot.lane.b32.xlu1 %v1339_v0, %s1554_s20  ;;  %v1336_v3 = vld [vmem:[%s1606_s19 + $0x50] sm:$0xf]  ;;  %v321_v6 = vld [vmem:[%s1606_s19] sm:$0xf] }
  0x12   : > { %288 = vrot.lane.b32.xlu0 %v1335_v1, %s1554_s20  ;;  %v323_v4 = vld [vmem:[%s1606_s19 + $0x8] sm:$0xf]  ;;  %v1338_v7 = vld [vmem:[%s1606_s19 + $0x60] sm:$0xf]  ;;  %v1337_v8 = vld [vmem:[%s1606_s19 + $0x58] sm:$0xf] }
  0x13   : > { %v355_v9 = vshrl.u32 %v323_v4, 16  ;;  %v358_v10 = vshll.u32 %v323_v4, 16  ;;  %v364_v11 = vshll.u32 %v324_v5, 16  ;;  %v322_v12 = vld [vmem:[%s1606_s19 + $0x4] sm:$0x1]  ;;  %v341_v13 = vshrl.u32 %v321_v6, 16 }
  0x14   : > { %v344_v14 = vshll.u32 %v321_v6, 16  ;;  %v350_v15 = vshll.u32 %v322_v12, 16  ;;  %v331_v16 = vld [vmem:[%s1606_s19 + $0x28] sm:$0xf]  ;;  %v332_v17 = vld [vmem:[%s1606_s19 + $0x2c] sm:$0x1] }
  0x15   : > { %298 = vrot.lane.b32.xlu1 %v1340_v2, %s1554_s20  ;;  %v357_v18 = vrot.slane %v355_v9, 4  ;;  %v360_v19 = vrot.slane %v358_v10, 5  ;;  %v366_v20 = vrot.slane %v364_v11, 5  ;;  %v343_v21 = vrot.slane %v341_v13, 4  ;;  %v329_v22 = vld [vmem:[%s1606_s19 + $0x20] sm:$0xf] }
  0x16   : > { %290 = vrot.lane.b32.xlu0 %v1336_v3, %s1554_s20  ;;  %v346_v23 = vrot.slane %v344_v14, 5  ;;  %v352_v24 = vrot.slane %v350_v15, 5  ;;  %v411_v25 = vshrl.u32 %v331_v16, 16  ;;  %v414_v26 = vshll.u32 %v331_v16, 16  ;;  %v330_v27 = vld [vmem:[%s1606_s19 + $0x24] sm:$0x1] }
  0x17   : > { %v1342_v28 = vld [vmem:[%s1606_s19 + $0x80] sm:$0xf]  ;;  %v1341_v29 = vld [vmem:[%s1606_s19 + $0x78] sm:$0xf]  ;;  %v361_v30 = vor.u32 %v360_v19, %v357_v18  ;;  %v420_v31 = vshll.u32 %v332_v17, 16  ;;  %v397_v32 = vshrl.u32 %v329_v22, 16 }
  0x18   : > { %v400_v33 = vshll.u32 %v329_v22, 16  ;;  %v327_v34 = vld [vmem:[%s1606_s19 + $0x18] sm:$0xf]  ;;  %v347_v36 = vor.u32 %v346_v23, %v343_v21  ;;  %v413_v37 = vrot.slane %v411_v25, 4  ;;  %v416_v38 = vrot.slane %v414_v26, 5 }
  0x19   : > { %294 = vrot.lane.b32.xlu1 %v1338_v7, %s1554_s20  ;;  %v406_v39 = vshll.u32 %v330_v27, 16  ;;  %v328_v40 = vld [vmem:[%s1606_s19 + $0x1c] sm:$0x1]  ;;  %v362_v41 = vrot.slane %v361_v30, 4  ;;  %v422_v42 = vrot.slane %v420_v31, 5  ;;  %v399_v43 = vrot.slane %v397_v32, 4 }
  0x1a   : > { %292 = vrot.lane.b32.xlu0 %v1337_v8, %s1554_s20  ;;  %v402_v44 = vrot.slane %v400_v33, 5  ;;  %v325_v45 = vld [vmem:[%s1606_s19 + $0x10] sm:$0xf]  ;;  %v348_v46 = vrot.slane %v347_v36, 4  ;;  %v417_v47 = vor.u32 %v416_v38, %v413_v37  ;;  %v383_v49 = vshrl.u32 %v327_v34, 16 }
  0x1b   : > { %v408_v48 = vrot.slane %v406_v39, 5  ;;  %v367_v50 = vsel %vm1633_vm2, %v362_v41, %v366_v20  ;;  %v386_v52 = vshll.u32 %v327_v34, 16  ;;  %v392_v53 = vshll.u32 %v328_v40, 16  ;;  %v326_v54 = vld [vmem:[%s1606_s19 + $0x14] sm:$0x1] }
  0x1c   : > { %v403_v51 = vor.u32 %v402_v44, %v399_v43  ;;  %v335_v55 = vld [vmem:[%s1606_s19 + $0x38] sm:$0xf]  ;;  %v353_v56 = vsel %vm1633_vm2, %v348_v46, %v352_v24  ;;  %v418_v57 = vrot.slane %v417_v47, 4  ;;  %v385_v58 = vrot.slane %v383_v49, 4  ;;  %v336_v60 = vld [vmem:[%s1606_s19 + $0x3c] sm:$0x1] }
  0x1d   : > { %302 = vrot.lane.b32.xlu1 %v1342_v28, %s1554_s20  ;;  %v369_v59 = vshrl.u32 %v325_v45, 16  ;;  %v388_v62 = vrot.slane %v386_v52, 5  ;;  %v394_v63 = vrot.slane %v392_v53, 5  ;;  %v372_v0 = vshll.u32 %v325_v45, 16  ;;  %v333_v1 = vld [vmem:[%s1606_s19 + $0x30] sm:$0xf] }
  0x1e   : > { %300 = vrot.lane.b32.xlu0 %v1341_v29, %s1554_s20  ;;  %v404_v61 = vrot.slane %v403_v51, 4  ;;  %v423_v2 = vsel %vm1633_vm2, %v418_v57, %v422_v42  ;;  %v378_v4 = vshll.u32 %v326_v54, 16  ;;  %v439_v5 = vshrl.u32 %v335_v55, 16  ;;  %v334_v10 = vld [vmem:[%s1606_s19 + $0x34] sm:$0x1] }
  0x1f   : > { %v371_v3 = vrot.slane %v369_v59, 4  ;;  %v389_v7 = vor.u32 %v388_v62, %v385_v58  ;;  %v374_v8 = vrot.slane %v372_v0, 5  ;;  %v442_v9 = vshll.u32 %v335_v55, 16  ;;  %v1361_v33 = vld [vmem:[%s1606_s19 + $0x98] sm:$0xf] }
  0x20   : > { %v409_v6 = vsel %vm1633_vm2, %v404_v61, %v408_v48  ;;  %v380_v11 = vrot.slane %v378_v4, 5  ;;  %v441_v12 = vrot.slane %v439_v5, 4  ;;  %v448_v13 = vshll.u32 %v336_v60, 16  ;;  %v1359_v34 = vld [vmem:[%s1606_s19 + $0x90] sm:$0xf] }
  0x21   : > { %454 = vrot.lane.b32.xlu1 %v367_v50, %s1555_s21  ;;  %v425_v14 = vshrl.u32 %v333_v1, 16  ;;  %v390_v15 = vrot.slane %v389_v7, 4  ;;  %v375_v16 = vor.u32 %v374_v8, %v371_v3  ;;  %v444_v17 = vrot.slane %v442_v9, 5  ;;  %v1369_v36 = vld [vmem:[%s1606_s19 + $0xb8] sm:$0xf] }
  0x22   : > { %452 = vrot.lane.b32.xlu0 %v353_v56, %s1555_s21  ;;  %v428_v18 = vshll.u32 %v333_v1, 16  ;;  %v434_v20 = vshll.u32 %v334_v10, 16  ;;  %v450_v25 = vrot.slane %v448_v13, 5  ;;  %v1367_v37 = vld [vmem:[%s1606_s19 + $0xb0] sm:$0xf]  ;;  %v616_v40 = vshrl.u32 %v1361_v33, 16 }
  0x23   : > { %v427_v19 = vrot.slane %v425_v14, 4  ;;  %v376_v21 = vrot.slane %v375_v16, 4  ;;  %v445_v22 = vor.u32 %v444_v17, %v441_v12  ;;  %v395_v24 = vsel %vm1633_vm2, %v390_v15, %v394_v63  ;;  %v1344_v38 = vld [vmem:[%s1606_s19 + $0x98] sm:$0xf]  ;;  %v1343_v39 = vld [vmem:[%s1606_s19 + $0x90] sm:$0xf] }
  0x24   : > { %v430_v23 = vrot.slane %v428_v18, 5  ;;  %v436_v29 = vrot.slane %v434_v20, 5  ;;  %v619_v41 = vshll.u32 %v1361_v33, 16  ;;  %v602_v42 = vshrl.u32 %v1359_v34, 16  ;;  %v1365_v44 = vld [vmem:[%s1606_s19 + $0xa8] sm:$0xf] }
  0x25   : > { %462 = vrot.lane.b32.xlu1 %v423_v2, %s1555_s21  ;;  %v381_v26 = vsel %vm1633_vm2, %v376_v21, %v380_v11  ;;  %v446_v27 = vrot.slane %v445_v22, 4  ;;  %v605_v43 = vshll.u32 %v1359_v34, 16  ;;  %v672_v45 = vshrl.u32 %v1369_v36, 16  ;;  %v1348_v49 = vld [vmem:[%s1606_s19 + $0xb8] sm:$0xf] }
  0x26   : > { %460 = vrot.lane.b32.xlu0 %v409_v6, %s1555_s21  ;;  %v431_v28 = vor.u32 %v430_v23, %v427_v19  ;;  %v675_v46 = vshll.u32 %v1369_v36, 16  ;;  %v658_v47 = vshrl.u32 %v1367_v37, 16  ;;  %v661_v48 = vshll.u32 %v1367_v37, 16  ;;  %v1347_v50 = vld [vmem:[%s1606_s19 + $0xb0] sm:$0xf] }
  0x27   : > { %v451_v31 = vsel %vm1633_vm2, %v446_v27, %v450_v25  ;;  %v1362_v51 = vld [vmem:[%s1606_s19 + $0x9c] sm:$0x1]  ;;  %v644_v52 = vshrl.u32 %v1365_v44, 16  ;;  %v647_v53 = vshll.u32 %v1365_v44, 16  ;;  %v618_v54 = vrot.slane %v616_v40, 4 }
  0x28   : > { %v432_v30 = vrot.slane %v431_v28, 4  ;;  %v621_v55 = vrot.slane %v619_v41, 5  ;;  %v1360_v56 = vld [vmem:[%s1606_s19 + $0x94] sm:$0x1]  ;;  %v604_v57 = vrot.slane %v602_v42, 4  ;;  %v607_v58 = vrot.slane %v605_v43, 5 }
  0x29   : > { %458 = vrot.lane.b32.xlu1 %v395_v24, %s1555_s21  ;;  %v1346_v59 = vld [vmem:[%s1606_s19 + $0xa8] sm:$0xf]  ;;  %v1345_v60 = vld [vmem:[%s1606_s19 + $0xa0] sm:$0xf]  ;;  %v1370_v61 = vld [vmem:[%s1606_s19 + $0xbc] sm:$0x1] }
  0x2a   : > { %456 = vrot.lane.b32.xlu0 %v381_v26, %s1555_s21  ;;  %v437_v32 = vsel %vm1633_vm2, %v432_v30, %v436_v29  ;;  %v674_v62 = vrot.slane %v672_v45, 4  ;;  %v677_v63 = vrot.slane %v675_v46, 5  ;;  %v660_v0 = vrot.slane %v658_v47, 4  ;;  %v1368_v2 = vld [vmem:[%s1606_s19 + $0xb4] sm:$0x1] }
  0x2b   : > { %v663_v1 = vrot.slane %v661_v48, 5  ;;  %v1366_v3 = vld [vmem:[%s1606_s19 + $0xac] sm:$0x1]  ;;  %v646_v4 = vrot.slane %v644_v52, 4  ;;  %v649_v5 = vrot.slane %v647_v53, 5  ;;  %v622_v8 = vor.u32 %v621_v55, %v618_v54 }
  0x2c   : > { %v1363_v6 = vld [vmem:[%s1606_s19 + $0xa0] sm:$0xf]  ;;  %v1364_v7 = vld [vmem:[%s1606_s19 + $0xa4] sm:$0x1]  ;;  %v625_v9 = vshll.u32 %v1362_v51, 16  ;;  %v608_v10 = vor.u32 %v607_v58, %v604_v57  ;;  %v611_v11 = vshll.u32 %v1360_v56, 16  ;;  %v678_v13 = vor.u32 %v677_v63, %v674_v62 }
  0x2d   : > { %466 = vrot.lane.b32.xlu1 %v451_v31, %s1555_s21  ;;  %v1373_v12 = vld [vmem:[%s1606_s19 + $0xc8] sm:$0xf]  ;;  %v681_v14 = vshll.u32 %v1370_v61, 16  ;;  %v664_v15 = vor.u32 %v663_v1, %v660_v0  ;;  %v667_v16 = vshll.u32 %v1368_v2, 16  ;;  %v653_v17 = vshll.u32 %v1366_v3, 16 }
  0x2e   : > { %464 = vrot.lane.b32.xlu0 %v437_v32, %s1555_s21  ;;  %v630_v18 = vshrl.u32 %v1363_v6, 16  ;;  %v633_v19 = vshll.u32 %v1363_v6, 16  ;;  %v639_v20 = vshll.u32 %v1364_v7, 16  ;;  %v1350_v21 = vld [vmem:[%s1606_s19 + $0xc8] sm:$0xf]  ;;  %v650_v23 = vor.u32 %v649_v5, %v646_v4 }
  0x2f   : > { %v1349_v22 = vld [vmem:[%s1606_s19 + $0xc0] sm:$0xf]  ;;  %v700_v24 = vshrl.u32 %v1373_v12, 16  ;;  %v1697_v25 = vrot.slane %v622_v8, 4  ;;  %v1699_v26 = vrot.slane %v625_v9, 5  ;;  %v1701_v27 = vrot.slane %v608_v10, 4 }
  0x30   : > { %v1703_v28 = vrot.slane %v611_v11, 5  ;;  %v1371_v29 = vld [vmem:[%s1606_s19 + $0xc0] sm:$0xf]  ;;  %v1351_v31 = vld [vmem:[%s1606_s19 + $0xd8] sm:$0xf]  ;;  %v1708_v32 = vrot.slane %v678_v13, 4 }
  0x31   : > { %504 = vrot.lane.b32.xlu1 %v1344_v38, %s1556_s22  ;;  %v1352_v30 = vld [vmem:[%s1606_s19 + $0xe0] sm:$0xf]  ;;  %v1710_v33 = vrot.slane %v681_v14, 5  ;;  %v1712_v34 = vrot.slane %v664_v15, 4  ;;  %v1714_v36 = vrot.slane %v667_v16, 5  ;;  %v1718_v37 = vrot.slane %v653_v17, 5 }
  0x32   : > { %502 = vrot.lane.b32.xlu0 %v1343_v39, %s1556_s22  ;;  %v1720_v38 = vrot.slane %v630_v18, 4  ;;  %v1722_v39 = vrot.slane %v633_v19, 5  ;;  %v1724_v40 = vrot.slane %v639_v20, 5  ;;  %v1727_v41 = vld [vmem:[%s1606_s19 + $0xcc] sm:$0x1]  ;;  %v1729_v42 = vrot.slane %v650_v23, 4 }
  0x33   : > { %v1731_v43 = vrot.slane %v700_v24, 4  ;;  %v703_v44 = vshll.u32 %v1373_v12, 16  ;;  %v686_v45 = vshrl.u32 %v1371_v29, 16  ;;  %v1393_v46 = vld [vmem:[%s1606_s19 + $0x10] sm:$0xf]  ;;  %v628_v47 = vsel %vm1633_vm2, %v1697_v25, %v1699_v26 }
  0x34   : > { %v614_v48 = vsel %vm1633_vm2, %v1701_v27, %v1703_v28  ;;  %v880_v51 = vshll.u32 %v1393_v46, 16  ;;  %v1391_v52 = vld [vmem:[%s1606_s19 + $0x8] sm:$0xf]  ;;  %v1356_v53 = vld [vmem:[%s1606_s19 + $0x100] sm:$0xf]  ;;  %v709_v55 = vshll.u32 %v1727_v41, 16  ;;  %v684_v6 = vsel %vm1633_vm2, %v1708_v32, %v1710_v33 }
  0x35   : > { %512 = vrot.lane.b32.xlu1 %v1348_v49, %s1556_s22  ;;  %v1394_v49 = vld [vmem:[%s1606_s19 + $0x14] sm:$0x1]  ;;  %v1355_v54 = vld [vmem:[%s1606_s19 + $0xf8] sm:$0xf]  ;;  %v1392_v57 = vld [vmem:[%s1606_s19 + $0xc] sm:$0x1] }
  0x36   : > { %510 = vrot.lane.b32.xlu0 %v1347_v50, %s1556_s22  ;;  %v877_v50 = vshrl.u32 %v1393_v46, 16  ;;  %v886_v56 = vshll.u32 %v1394_v49, 16  ;;  %v863_v58 = vshrl.u32 %v1391_v52, 16  ;;  %v882_v62 = vrot.slane %v880_v51, 5  ;;  %v258_v0 = vld [vmem:[%s1606_s19 + $0x20] sm:$0xf] }
  0x37   : > { %v872_v63 = vshll.u32 %v1392_v57, 16  ;;  %v1751_v1 = vrot.slane %v703_v44, 5  ;;  %v1753_v2 = vrot.slane %v686_v45, 4  ;;  %267 = vst.msk [vmem:[#allocation2 + $0x10] sm:$0xf] %vm262_vm3, %v258_v0 }
  0x38   : > { %v879_v61 = vrot.slane %v877_v50, 4  ;;  %v865_v3 = vrot.slane %v863_v58, 4  ;;  %v254_v5 = vld [vmem:[%s1606_s19] sm:$0xf]  ;;  %v1761_v8 = vrot.slane %v886_v56, 5  ;;  %v636_v56 = vor.u32 %v1722_v39, %v1720_v38 }
  0x39   : > { %508 = vrot.lane.b32.xlu1 %v1346_v59, %s1556_s22  ;;  %v866_v59 = vshll.u32 %v1391_v52, 16  ;;  %v1763_v9 = vrot.slane %v872_v63, 5  ;;  %263 = vst.msk [vmem:[#allocation2] sm:$0xf] %vm262_vm3, %v254_v5  ;;  %v1401_v10 = vld [vmem:[%s1606_s19 + $0x30] sm:$0xf] }
  0x3a   : > { %506 = vrot.lane.b32.xlu0 %v1345_v60, %s1556_s22  ;;  %v689_v60 = vshll.u32 %v1371_v29, 16  ;;  %v883_v7 = vor.u32 %v882_v62, %v879_v61  ;;  %v1402_v11 = vld [vmem:[%s1606_s19 + $0x34] sm:$0x1]  ;;  %v1354_v12 = vld [vmem:[%s1606_s19 + $0xf0] sm:$0xf]  ;;  %v933_v15 = vshrl.u32 %v1401_v10, 16 }
  0x3b   : > { %v868_v4 = vrot.slane %v866_v59, 5  ;;  %v1353_v13 = vld [vmem:[%s1606_s19 + $0xe8] sm:$0xf]  ;;  %v936_v16 = vshll.u32 %v1401_v10, 16  ;;  %v942_v17 = vshll.u32 %v1402_v11, 16 }
  0x3c   : > { %v1399_v18 = vld [vmem:[%s1606_s19 + $0x28] sm:$0xf]  ;;  %v1773_v19 = vrot.slane %v689_v60, 5  ;;  %v1775_v20 = vrot.slane %v883_v7, 4  ;;  %v935_v29 = vrot.slane %v933_v15, 4 }
  0x3d   : > { %516 = vrot.lane.b32.xlu1 %v1350_v21, %s1556_s22  ;;  %v869_v14 = vor.u32 %v868_v4, %v865_v3  ;;  %v1400_v21 = vld [vmem:[%s1606_s19 + $0x2c] sm:$0x1]  ;;  %v922_v23 = vshll.u32 %v1399_v18, 16  ;;  %v259_v44 = vld [vmem:[%s1606_s19 + $0x28] sm:$0xf] }
  0x3e   : > { %514 = vrot.lane.b32.xlu0 %v1349_v22, %s1556_s22  ;;  %v919_v22 = vshrl.u32 %v1399_v18, 16  ;;  %v889_v45 = vsel %vm1633_vm2, %v1775_v20, %v1761_v8  ;;  %v928_v50 = vshll.u32 %v1400_v21, 16  ;;  %268 = vst.msk [vmem:[#allocation2 + $0x14] sm:$0xf] %vm262_vm3, %v259_v44  ;;  %v255_v51 = vld [vmem:[%s1606_s19 + $0x8] sm:$0xf]  ;;  %v692_v25 = vor.u32 %v1773_v19, %v1753_v2 }
  0x3f   : > { %v1778_v24 = vrot.slane %v869_v14, 4  ;;  %v924_v49 = vrot.slane %v922_v23, 5  ;;  %v1358_v52 = vld [vmem:[%s1606_s19 + $0x110] sm:$0xf]  ;;  %264 = vst.msk [vmem:[#allocation2 + $0x4] sm:$0xf] %vm262_vm3, %v255_v51 }
  0x40   : > { %v921_v46 = vrot.slane %v919_v22, 4  ;;  %v1397_v59 = vld [vmem:[%s1606_s19 + $0x20] sm:$0xf]  ;;  %v1398_v60 = vld [vmem:[%s1606_s19 + $0x24] sm:$0x1]  ;;  %v1807_v38 = vrot.slane %v928_v50, 5 }
  0x41   : > { %554 = vrot.lane.b32.xlu1 %v1352_v30, %s1557_s23  ;;  %v938_v30 = vrot.slane %v936_v16, 5  ;;  %v875_v57 = vsel %vm1633_vm2, %v1778_v24, %v1763_v9  ;;  %v1395_v61 = vld [vmem:[%s1606_s19 + $0x18] sm:$0xf]  ;;  %v905_v39 = vshrl.u32 %v1397_v59, 16  ;;  %v908_v63 = vshll.u32 %v1397_v59, 16 }
  0x42   : > { %552 = vrot.lane.b32.xlu0 %v1351_v31, %s1557_s23  ;;  %v1780_v31 = vrot.slane %v942_v17, 5  ;;  %v925_v62 = vor.u32 %v924_v49, %v921_v46  ;;  %v1396_v0 = vld [vmem:[%s1606_s19 + $0x1c] sm:$0x1]  ;;  %v914_v4 = vshll.u32 %v1398_v60, 16  ;;  %v891_v5 = vshrl.u32 %v1395_v61, 16 }
  0x43   : > { %v939_v58 = vor.u32 %v938_v30, %v935_v29  ;;  %v894_v7 = vshll.u32 %v1395_v61, 16  ;;  %v257_v10 = vld [vmem:[%s1606_s19 + $0x18] sm:$0xf]  ;;  %v1372_v11 = vld [vmem:[%s1606_s19 + $0xc4] sm:$0x1]  ;;  %v900_v15 = vshll.u32 %v1396_v0, 16 }
  0x44   : > { %v1814_v14 = vrot.slane %v925_v62, 4  ;;  %266 = vst.msk [vmem:[#allocation2 + $0xc] sm:$0xf] %vm262_vm3, %v257_v10  ;;  %v256_v16 = vld [vmem:[%s1606_s19 + $0x10] sm:$0xf]  ;;  %v1822_v18 = vrot.slane %v914_v4, 5 }
  0x45   : > { %562 = vrot.lane.b32.xlu1 %v1356_v53, %s1557_s23  ;;  %v1357_v53 = vld [vmem:[%s1606_s19 + $0x108] sm:$0xf]  ;;  %v1810_v3 = vrot.slane %v939_v58, 4  ;;  %v893_v21 = vrot.slane %v891_v5, 4  ;;  %v896_v22 = vrot.slane %v894_v7, 5  ;;  %v1832_v44 = vrot.slane %v900_v15, 5 }
  0x46   : > { %560 = vrot.lane.b32.xlu0 %v1355_v54, %s1557_s23  ;;  %v670_v54 = vsel %vm1633_vm2, %v1712_v34, %v1714_v36  ;;  %265 = vst.msk [vmem:[#allocation2 + $0x8] sm:$0xf] %vm262_vm3, %v256_v16  ;;  %v1405_v23 = vld [vmem:[%s1606_s19 + $0x40] sm:$0xf]  ;;  %v931_v29 = vsel %vm1633_vm2, %v1814_v14, %v1807_v38  ;;  %v1406_v46 = vld [vmem:[%s1606_s19 + $0x44] sm:$0x1] }
  0x47   : > { %v945_v17 = vsel %vm1633_vm2, %v1810_v3, %v1780_v31  ;;  %v961_v49 = vshrl.u32 %v1405_v23, 16  ;;  %v1403_v50 = vld [vmem:[%s1606_s19 + $0x38] sm:$0xf]  ;;  %v897_v51 = vor.u32 %v896_v22, %v893_v21  ;;  %v964_v58 = vshll.u32 %v1405_v23, 16  ;;  %v1404_v60 = vld [vmem:[%s1606_s19 + $0x3c] sm:$0x1] }
  0x48   : > { %v970_v59 = vshll.u32 %v1406_v46, 16  ;;  %v950_v62 = vshll.u32 %v1403_v50, 16  ;;  %v695_v0 = vshll.u32 %v1372_v11, 16  ;;  %v260_v10 = vld [vmem:[%s1606_s19 + $0x30] sm:$0xf]  ;;  %v637_v11 = vrot.slane %v636_v56, 4 }
  0x49   : > { %558 = vrot.lane.b32.xlu1 %v1354_v12, %s1557_s23  ;;  %v907_v12 = vrot.slane %v905_v39, 4  ;;  %v956_v39 = vshll.u32 %v1404_v60, 16  ;;  %v1840_v4 = vrot.slane %v897_v51, 4  ;;  %v966_v5 = vrot.slane %v964_v58, 5  ;;  %269 = vst.msk [vmem:[#allocation2 + $0x18] sm:$0xf] %vm262_vm3, %v260_v10 }
  0x4a   : > { %556 = vrot.lane.b32.xlu0 %v1353_v13, %s1557_s23  ;;  %v910_v13 = vrot.slane %v908_v63, 5  ;;  %v261_v63 = vld [vmem:[%s1606_s19 + $0x38] sm:$0xf]  ;;  %v952_v15 = vrot.slane %v950_v62, 5  ;;  %v1869_v28 = vrot.slane %v970_v59, 5  ;;  %v711_v2 = vrot.slane %v709_v55, 5 }
  0x4b   : > { %270 = vst.msk [vmem:[#allocation2 + $0x1c] sm:$0xf] %vm262_vm3, %v261_v63  ;;  %v903_v26 = vsel %vm1633_vm2, %v1840_v4, %v1832_v44  ;;  %v697_v19 = vrot.slane %v695_v0, 5  ;;  %v642_v33 = vsel %vm1633_vm2, %v637_v11, %v1724_v40  ;;  %v693_v36 = vrot.slane %v692_v25, 4  ;;  %v1376_v55 = vld [vmem:[%s1606_s19 + $0x10] sm:$0xf] }
  0x4c   : > { %v911_v30 = vor.u32 %v910_v13, %v907_v12  ;;  %v706_v12 = vor.u32 %v1751_v1, %v1731_v43  ;;  %v656_v1 = vsel %vm1633_vm2, %v1729_v42, %v1718_v37  ;;  %v1379_v56 = vld [vmem:[%s1606_s19 + $0x28] sm:$0xf]  ;;  %v1378_v16 = vld [vmem:[%s1606_s19 + $0x20] sm:$0xf]  ;;  %v1377_v21 = vld [vmem:[%s1606_s19 + $0x18] sm:$0xf] }
  0x4d   : > { %566 = vrot.lane.b32.xlu1 %v1358_v52, %s1557_s23  ;;  %v947_v52 = vshrl.u32 %v1403_v50, 16  ;;  %v698_v42 = vsel %vm1633_vm2, %v693_v36, %v697_v19  ;;  %v1382_v22 = vld [vmem:[%s1606_s19 + $0x40] sm:$0xf]  ;;  %v1381_v23 = vld [vmem:[%s1606_s19 + $0x38] sm:$0xf]  ;;  %v1524_v62 = vld [vmem:[%s2064_s1 + $0x8] sm:$0xff]  }
  0x4e   : > { %564 = vrot.lane.b32.xlu0 %v1357_v53, %s1557_s23  ;;  %v1837_v61 = vrot.slane %v911_v30, 4  ;;  %v963_v53 = vrot.slane %v961_v49, 4  ;;  %v707_v34 = vrot.slane %v706_v12, 4  ;;  %v1384_v30 = vld [vmem:[%s1606_s19 + $0x58] sm:$0xf] }
  0x4f   : > { %v949_v7 = vrot.slane %v947_v52, 4  ;;  %v1383_v46 = vld [vmem:[%s1606_s19 + $0x50] sm:$0xf]  ;;  %v1388_v49 = vld [vmem:[%s1606_s19 + $0x78] sm:$0xf] }
  0x50   : > { %v917_v13 = vsel %vm1633_vm2, %v1837_v61, %v1822_v18  ;;  %v967_v27 = vor.u32 %v966_v5, %v963_v53  ;;  %v712_v40 = vsel %vm1633_vm2, %v707_v34, %v711_v2  ;;  %v1387_v50 = vld [vmem:[%s1606_s19 + $0x70] sm:$0xf]  ;;  %v1386_v51 = vld [vmem:[%s1606_s19 + $0x68] sm:$0xf]  ;;  %v1385_v58 = vld [vmem:[%s1606_s19 + $0x60] sm:$0xf] }
  0x51   : > { %715 = vrot.lane.b32.xlu1 %v628_v47, %s1558_s24  ;;  %v953_v43 = vor.u32 %v952_v15, %v949_v7  ;;  %v1871_v47 = vrot.slane %v956_v39, 5  ;;  %v1523_v59 = vld [vmem:[%s2064_s1 + $0x10] ss:$0 sps:$4 sm:$0x33]   ;;  %v1390_v52 = vld [vmem:[%s1606_s19 + $0x88] sm:$0xf] }
  0x52   : > { %713 = vrot.lane.b32.xlu0 %v614_v48, %s1558_s24  ;;  %v1873_v48 = vrot.slane %v967_v27, 4  ;;  %v1077_v60 = vsel %vm1075_vm4, %v1523_v59, 0  ;;  %v1389_v53 = vld [vmem:[%s1606_s19 + $0x80] sm:$0xf]  ;;  %1488 = vmatprep.subr.msk.bf16.mxu0 %vm1075_vm4, %v1523_v59 }
  0x53   : > { %v1893_v32 = vrot.slane %v953_v43, 4  ;;  %1489 = vmatprep.subr.msk.bf16.mxu1 %vm1075_vm4, %v1523_v59  ;;  %1469 = vmatpush3.bf16.msra.mxu0 %v1077_v60  ;;  %v1526_v39 = vld [vmem:[%s2064_s1] sm:$0xff]  }
  0x54   : > { %v973_v37 = vsel %vm1633_vm2, %v1873_v48, %v1869_v28  ;;  %1485 = vmatpush3.bf16.msra.mxu1 %v1077_v60  ;;  %1470 = vmatprep.subr.bf16.mxu0 %v1524_v62 }
  0x55   : > { %723 = vrot.lane.b32.xlu1 %v684_v6, %s1558_s24  ;;  %v959_v41 = vsel %vm1633_vm2, %v1893_v32, %v1871_v47  ;;  %v1375_v6 = vld [vmem:[%s1606_s19 + $0x8] sm:$0xf]  ;;  %1483 = vmatprep.subr.bf16.mxu1 %v1524_v62 }
  0x56   : > { %721 = vrot.lane.b32.xlu0 %v670_v54, %s1558_s24  ;;  %v1380_v54 = vld [vmem:[%s1606_s19 + $0x30] sm:$0xf] }
  0x57   : > { %1471 = vmatpush3.bf16.msra.mxu0 %v1524_v62 }
  0x58   : > { %1486 = vmatpush3.bf16.msra.mxu1 %v1524_v62  ;;  %1472 = vmatprep.subr.bf16.mxu0 %v1526_v39 }
  0x59   : > { %719 = vrot.lane.b32.xlu1 %v656_v1, %s1558_s24  ;;  %1484 = vmatprep.subr.bf16.mxu1 %v1526_v39 }
  0x5a   : > { %717 = vrot.lane.b32.xlu0 %v642_v33, %s1558_s24 }
  0x5b   : > { %1473 = vmatpush3.bf16.msra.mxu0 %v1526_v39 }
  0x5c   : > { %1487 = vmatpush3.bf16.msra.mxu1 %v1526_v39 }
  0x5d   : > { %727 = vrot.lane.b32.xlu1 %v712_v40, %s1558_s24 }
  0x5e   : > { %725 = vrot.lane.b32.xlu0 %v698_v42, %s1558_s24 }
  0x61   : > { %765 = vrot.lane.b32.xlu1 %v1376_v55, %s1559_s25 }
  0x62   : > { %763 = vrot.lane.b32.xlu0 %v1375_v6, %s1559_s25 }
  0x65   : > { %773 = vrot.lane.b32.xlu1 %v1380_v54, %s1559_s25 }
  0x66   : > { %771 = vrot.lane.b32.xlu0 %v1379_v56, %s1559_s25 }
  0x69   : > { %769 = vrot.lane.b32.xlu1 %v1378_v16, %s1559_s25 }
  0x6a   : > { %767 = vrot.lane.b32.xlu0 %v1377_v21, %s1559_s25 }
  0x6d   : > { %777 = vrot.lane.b32.xlu1 %v1382_v22, %s1559_s25 }
  0x6e   : > { %775 = vrot.lane.b32.xlu0 %v1381_v23, %s1559_s25 }
  0x71   : > { %815 = vrot.lane.b32.xlu1 %v1384_v30, %s1560_s26 }
  0x72   : > { %813 = vrot.lane.b32.xlu0 %v1383_v46, %s1560_s26 }
  0x75   : > { %823 = vrot.lane.b32.xlu1 %v1388_v49, %s1560_s26 }
  0x76   : > { %821 = vrot.lane.b32.xlu0 %v1387_v50, %s1560_s26 }
  0x79   : > { %819 = vrot.lane.b32.xlu1 %v1386_v51, %s1560_s26 }
  0x7a   : > { %817 = vrot.lane.b32.xlu0 %v1385_v58, %s1560_s26 }
  0x7d   : > { %827 = vrot.lane.b32.xlu1 %v1390_v52, %s1560_s26 }
  0x7e   : > { %825 = vrot.lane.b32.xlu0 %v1389_v53, %s1560_s26 }
  0x81   : > { %976 = vrot.lane.b32.xlu1 %v889_v45, %s1561_s6 }
  0x82   : > { %974 = vrot.lane.b32.xlu0 %v875_v57, %s1561_s6 }
  0x83   : > { %v297_v63 = vpop.permute.xlu1 %296 }
  0x84   : > { %v289_v0 = vpop.permute.xlu0 %288  ;;  %317 = vst.msk [vmem:[#allocation2 + $0x10] sm:$0xf] %vm312_vm5, %v297_v63 }
  0x85   : > { %313 = vst.msk [vmem:[#allocation2] sm:$0xf] %vm312_vm5, %v289_v0  ;;  %984 = vrot.lane.b32.xlu1 %v945_v17, %s1561_s6 }
  0x86   : > { %982 = vrot.lane.b32.xlu0 %v931_v29, %s1561_s6 }
  0x87   : > { %v299_v8 = vpop.permute.xlu1 %298 }
  0x88   : > { %v291_v9 = vpop.permute.xlu0 %290  ;;  %318 = vst.msk [vmem:[#allocation2 + $0x14] sm:$0xf] %vm312_vm5, %v299_v8 }
  0x89   : > { %314 = vst.msk [vmem:[#allocation2 + $0x4] sm:$0xf] %vm312_vm5, %v291_v9  ;;  %980 = vrot.lane.b32.xlu1 %v917_v13, %s1561_s6 }
  0x8a   : > { %978 = vrot.lane.b32.xlu0 %v903_v26, %s1561_s6 }
  0x8b   : > { %v295_v20 = vpop.permute.xlu1 %294 }
  0x8c   : > { %v293_v24 = vpop.permute.xlu0 %292  ;;  %316 = vst.msk [vmem:[#allocation2 + $0xc] sm:$0xf] %vm312_vm5, %v295_v20 }
  0x8d   : > { %315 = vst.msk [vmem:[#allocation2 + $0x8] sm:$0xf] %vm312_vm5, %v293_v24  ;;  %988 = vrot.lane.b32.xlu1 %v973_v37, %s1561_s6  ;;  %v1407_v24 = vld [vmem:[%s2065_s2] ss:$0 sm:$0xff] }
  0x8e   : > { %986 = vrot.lane.b32.xlu0 %v959_v41, %s1561_s6 }
  0x8f   : > { %v303_v31 = vpop.permute.xlu1 %302 }
  0x90   : > { %v301_v45 = vpop.permute.xlu0 %300  ;;  %320 = vst.msk [vmem:[#allocation2 + $0x1c] sm:$0xf] %vm312_vm5, %v303_v31 }
  0x91   : > { %319 = vst.msk [vmem:[#allocation2 + $0x18] sm:$0xf] %vm312_vm5, %v301_v45 }
  0x93   : > { %v455_v57 = vpop.permute.xlu1 %454 }
  0x94   : > { %v453_v38 = vpop.permute.xlu0 %452  ;;  %478 = vst.msk [vmem:[#allocation2 + $0x4] sm:$0xf] %vm476_vm6, %v455_v57 }
  0x95   : > { %477 = vst.msk [vmem:[#allocation2] sm:$0xf] %vm476_vm6, %v453_v38 }
  0x97   : > { %v463_v3 = vpop.permute.xlu1 %462 }
  0x98   : > { %v461_v14 = vpop.permute.xlu0 %460  ;;  %482 = vst.msk [vmem:[#allocation2 + $0x14] sm:$0xf] %vm476_vm6, %v463_v3 }
  0x99   : > { %481 = vst.msk [vmem:[#allocation2 + $0x10] sm:$0xf] %vm476_vm6, %v461_v14 }
  0x9b   : > { %v459_v35 = vpop.permute.xlu1 %458 }
  0x9c   : > { %v457_v17 = vpop.permute.xlu0 %456  ;;  %480 = vst.msk [vmem:[#allocation2 + $0xc] sm:$0xf] %vm476_vm6, %v459_v35 }
  0x9d   : > { %479 = vst.msk [vmem:[#allocation2 + $0x8] sm:$0xf] %vm476_vm6, %v457_v17 }
  0x9f   : > { %v467_v18 = vpop.permute.xlu1 %466 }
  0xa0   : > { %v465_v29 = vpop.permute.xlu0 %464  ;;  %484 = vst.msk [vmem:[#allocation2 + $0x1c] sm:$0xf] %vm476_vm6, %v467_v18 }
  0xa1   : > { %483 = vst.msk [vmem:[#allocation2 + $0x18] sm:$0xf] %vm476_vm6, %v465_v29 }
  0xa3   : > { %v505_v44 = vpop.permute.xlu1 %504 }
  0xa4   : > { %v503_v61 = vpop.permute.xlu0 %502  ;;  %528 = vst.msk [vmem:[#allocation2 + $0x4] sm:$0xf] %vm526_vm7, %v505_v44 }
  0xa5   : > { %527 = vst.msk [vmem:[#allocation2] sm:$0xf] %vm526_vm7, %v503_v61 }
  0xa7   : > { %v513_v4 = vpop.permute.xlu1 %512 }
  0xa8   : > { %v511_v5 = vpop.permute.xlu0 %510  ;;  %532 = vst.msk [vmem:[#allocation2 + $0x14] sm:$0xf] %vm526_vm7, %v513_v4 }
  0xa9   : > { %531 = vst.msk [vmem:[#allocation2 + $0x10] sm:$0xf] %vm526_vm7, %v511_v5 }
  0xab   : > { %v509_v7 = vpop.permute.xlu1 %508 }
  0xac   : > { %v507_v10 = vpop.permute.xlu0 %506  ;;  %530 = vst.msk [vmem:[#allocation2 + $0xc] sm:$0xf] %vm526_vm7, %v509_v7 }
  0xad   : > { %529 = vst.msk [vmem:[#allocation2 + $0x8] sm:$0xf] %vm526_vm7, %v507_v10 }
  0xaf   : > { %v517_v11 = vpop.permute.xlu1 %516 }
  0xb0   : > { %v515_v12 = vpop.permute.xlu0 %514  ;;  %534 = vst.msk [vmem:[#allocation2 + $0x1c] sm:$0xf] %vm526_vm7, %v517_v11 }
  0xb1   : > { %533 = vst.msk [vmem:[#allocation2 + $0x18] sm:$0xf] %vm526_vm7, %v515_v12 }
  0xb3   : > { %v555_v13 = vpop.permute.xlu1 %554 }
  0xb4   : > { %v553_v15 = vpop.permute.xlu0 %552  ;;  %578 = vst.msk [vmem:[#allocation2 + $0x4] sm:$0xf] %vm576_vm8, %v555_v13 }
  0xb5   : > { %577 = vst.msk [vmem:[#allocation2] sm:$0xf] %vm576_vm8, %v553_v15 }
  0xb7   : > { %v563_v25 = vpop.permute.xlu1 %562 }
  0xb8   : > { %v561_v26 = vpop.permute.xlu0 %560  ;;  %582 = vst.msk [vmem:[#allocation2 + $0x14] sm:$0xf] %vm576_vm8, %v563_v25 }
  0xb9   : > { %581 = vst.msk [vmem:[#allocation2 + $0x10] sm:$0xf] %vm576_vm8, %v561_v26 }
  0xbb   : > { %v559_v27 = vpop.permute.xlu1 %558 }
  0xbc   : > { %v557_v28 = vpop.permute.xlu0 %556  ;;  %580 = vst.msk [vmem:[#allocation2 + $0xc] sm:$0xf] %vm576_vm8, %v559_v27 }
  0xbd   : > { %579 = vst.msk [vmem:[#allocation2 + $0x8] sm:$0xf] %vm576_vm8, %v557_v28 }
  0xbf   : > { %v567_v43 = vpop.permute.xlu1 %566 }
  0xc0   : > { %v565_v47 = vpop.permute.xlu0 %564  ;;  %584 = vst.msk [vmem:[#allocation2 + $0x1c] sm:$0xf] %vm576_vm8, %v567_v43 }
  0xc1   : > { %583 = vst.msk [vmem:[#allocation2 + $0x18] sm:$0xf] %vm576_vm8, %v565_v47 }
  0xc3   : > { %v716_v48 = vpop.permute.xlu1 %715 }
  0xc4   : > { %v714_v1 = vpop.permute.xlu0 %713  ;;  %739 = vst.msk [vmem:[#allocation2 + $0x4] sm:$0xf] %vm737_vm9, %v716_v48 }
  0xc5   : > { %738 = vst.msk [vmem:[#allocation2] sm:$0xf] %vm737_vm9, %v714_v1 }
  0xc7   : > { %v724_v2 = vpop.permute.xlu1 %723 }
  0xc8   : > { %v722_v19 = vpop.permute.xlu0 %721  ;;  %743 = vst.msk [vmem:[#allocation2 + $0x14] sm:$0xf] %vm737_vm9, %v724_v2 }
  0xc9   : > { %742 = vst.msk [vmem:[#allocation2 + $0x10] sm:$0xf] %vm737_vm9, %v722_v19 }
  0xcb   : > { %v720_v32 = vpop.permute.xlu1 %719 }
  0xcc   : > { %v718_v33 = vpop.permute.xlu0 %717  ;;  %741 = vst.msk [vmem:[#allocation2 + $0xc] sm:$0xf] %vm737_vm9, %v720_v32 }
  0xcd   : > { %740 = vst.msk [vmem:[#allocation2 + $0x8] sm:$0xf] %vm737_vm9, %v718_v33 }
  0xcf   : > { %v728_v34 = vpop.permute.xlu1 %727 }
  0xd0   : > { %v726_v36 = vpop.permute.xlu0 %725  ;;  %745 = vst.msk [vmem:[#allocation2 + $0x1c] sm:$0xf] %vm737_vm9, %v728_v34 }
  0xd1   : > { %744 = vst.msk [vmem:[#allocation2 + $0x18] sm:$0xf] %vm737_vm9, %v726_v36 }
  0xd3   : > { %v766_v37 = vpop.permute.xlu1 %765 }
  0xd4   : > { %v764_v41 = vpop.permute.xlu0 %763  ;;  %789 = vst.msk [vmem:[#allocation2 + $0x4] sm:$0xf] %vm787_vm10, %v766_v37 }
  0xd5   : > { %788 = vst.msk [vmem:[#allocation2] sm:$0xf] %vm787_vm10, %v764_v41 }
  0xd7   : > { %v774_v40 = vpop.permute.xlu1 %773 }
  0xd8   : > { %v772_v42 = vpop.permute.xlu0 %771  ;;  %793 = vst.msk [vmem:[#allocation2 + $0x14] sm:$0xf] %vm787_vm10, %v774_v40 }
  0xd9   : > { %792 = vst.msk [vmem:[#allocation2 + $0x10] sm:$0xf] %vm787_vm10, %v772_v42 }
  0xdb   : > { %v770_v55 = vpop.permute.xlu1 %769 }
  0xdc   : > { %v768_v6 = vpop.permute.xlu0 %767  ;;  %791 = vst.msk [vmem:[#allocation2 + $0xc] sm:$0xf] %vm787_vm10, %v770_v55 }
  0xdd   : > { %790 = vst.msk [vmem:[#allocation2 + $0x8] sm:$0xf] %vm787_vm10, %v768_v6 }
  0xdf   : > { %v778_v54 = vpop.permute.xlu1 %777 }
  0xe0   : > { %v776_v56 = vpop.permute.xlu0 %775  ;;  %795 = vst.msk [vmem:[#allocation2 + $0x1c] sm:$0xf] %vm787_vm10, %v778_v54 }
  0xe1   : > { %794 = vst.msk [vmem:[#allocation2 + $0x18] sm:$0xf] %vm787_vm10, %v776_v56 }
  0xe3   : > { %v816_v16 = vpop.permute.xlu1 %815 }
  0xe4   : > { %v814_v21 = vpop.permute.xlu0 %813  ;;  %839 = vst.msk [vmem:[#allocation2 + $0x4] sm:$0xf] %vm837_vm11, %v816_v16 }
  0xe5   : > { %838 = vst.msk [vmem:[#allocation2] sm:$0xf] %vm837_vm11, %v814_v21 }
  0xe7   : > { %v824_v22 = vpop.permute.xlu1 %823 }
  0xe8   : > { %v822_v23 = vpop.permute.xlu0 %821  ;;  %843 = vst.msk [vmem:[#allocation2 + $0x14] sm:$0xf] %vm837_vm11, %v824_v22 }
  0xe9   : > { %842 = vst.msk [vmem:[#allocation2 + $0x10] sm:$0xf] %vm837_vm11, %v822_v23 }
  0xeb   : > { %v820_v30 = vpop.permute.xlu1 %819 }
  0xec   : > { %v818_v46 = vpop.permute.xlu0 %817  ;;  %841 = vst.msk [vmem:[#allocation2 + $0xc] sm:$0xf] %vm837_vm11, %v820_v30 }
  0xed   : > { %840 = vst.msk [vmem:[#allocation2 + $0x8] sm:$0xf] %vm837_vm11, %v818_v46 }
  0xef   : > { %v828_v49 = vpop.permute.xlu1 %827 }
  0xf0   : > { %v826_v50 = vpop.permute.xlu0 %825  ;;  %845 = vst.msk [vmem:[#allocation2 + $0x1c] sm:$0xf] %vm837_vm11, %v828_v49 }
  0xf1   : > { %844 = vst.msk [vmem:[#allocation2 + $0x18] sm:$0xf] %vm837_vm11, %v826_v50 }
  0xf3   : > { %v977_v51 = vpop.permute.xlu1 %976 }
  0xf4   : > { %v975_v58 = vpop.permute.xlu0 %974  ;;  %1000 = vst.msk [vmem:[#allocation2 + $0x4] sm:$0xf] %vm998_vm12, %v977_v51 }
  0xf5   : > { %999 = vst.msk [vmem:[#allocation2] sm:$0xf] %vm998_vm12, %v975_v58 }
  0xf7   : > { %v985_v59 = vpop.permute.xlu1 %984 }
  0xf8   : > { %v983_v60 = vpop.permute.xlu0 %982  ;;  %1004 = vst.msk [vmem:[#allocation2 + $0x14] sm:$0xf] %vm998_vm12, %v985_v59 }
  0xf9   : > { %1003 = vst.msk [vmem:[#allocation2 + $0x10] sm:$0xf] %vm998_vm12, %v983_v60 }
  0xfb   : > { %v981_v52 = vpop.permute.xlu1 %980 }
  0xfc   : > { %v979_v53 = vpop.permute.xlu0 %978  ;;  %v1525_v62 = vld [vmem:[#allocation2] sm:$0xff]   ;;  %1002 = vst.msk [vmem:[#allocation2 + $0xc] sm:$0xf] %vm998_vm12, %v981_v52 }
  0xfd   : > { %1001 = vst.msk [vmem:[#allocation2 + $0x8] sm:$0xf] %vm998_vm12, %v979_v53  ;;  %1474 = vmatprep.mubr.msk.bf16.mxu0 %vm1062_vm13, %v1525_v62 }
  0xff   : > { %v989_v39 = vpop.permute.xlu1 %988 }
 0x100   : > { %v987_v63 = vpop.permute.xlu0 %986  ;;  %v1527_v0 = vld [vmem:[#allocation2 + $0x10] sm:$0xff]   ;;  %1006 = vst.msk [vmem:[#allocation2 + $0x1c] sm:$0xf] %vm998_vm12, %v989_v39 }
 0x101   : > { %1005 = vst.msk [vmem:[#allocation2 + $0x18] sm:$0xf] %vm998_vm12, %v987_v63  ;;  %1478 = vmatprep.mubr.msk.bf16.mxu1 %vm1062_vm13, %v1527_v0 }
 0x104   : > { %v1528_v8 = vld [vmem:[#allocation2 + $0x8] sm:$0xff]  }
 0x105   : > { %1475 = vmatmul.mubr.msk.bf16.vlgmr.msra.gmra.mxu0 %vm1062_vm13, %v1528_v8 }
 0x108   : > { %v1529_v9 = vld [vmem:[#allocation2 + $0x18] sm:$0xff]  }
 0x109   : > { %1479 = vmatmul.mubr.msk.bf16.vlgmr.msra.gmra.mxu1 %vm1062_vm13, %v1529_v9 }
 0x1c5   : > { %v1476_v20 = vpop.f32.mrf.mxu0 }
 0x1c6   : > { %v1122_v45 = vadd.f32 %v1476_v20, %v1407_v24 }
 0x1c7   : > { %v1113_v31 = vpop.f32.mrf.mxu0 }
 0x1c8   : > { %v1114_v57 = vadd.f32 %v1407_v24, %v1113_v31  ;;  %v1146_v18 = vmax.f32 %v1122_v45, 0.0 }
 0x1c9   : > { %v1477_v38 = vpop.f32.mrf.mxu0  ;;  %v1480_v3 = vpop.f32.mrf.mxu1 }
 0x1ca   : > { %v1125_v14 = vadd.f32 %v1477_v38, %v1407_v24  ;;  %v1138_v44 = vadd.f32 %v1480_v3, %v1407_v24  ;;  %v1144_v4 = vmax.f32 %v1114_v57, 0.0 }
 0x1cb   : > { %v1116_v35 = vpop.f32.mrf.mxu0  ;;  %v1129_v17 = vpop.f32.mrf.mxu1 }
 0x1cc   : > { %v1147_v29 = vmax.f32 %v1125_v14, 0.0  ;;  %v1117_v61 = vadd.f32 %v1407_v24, %v1116_v35  ;;  %v1130_v11 = vadd.f32 %v1407_v24, %v1129_v17  ;;  %v1150_v15 = vmax.f32 %v1138_v44, 0.0 }
 0x1cd   : > { %v1481_v5 = vpop.f32.mrf.mxu1 }
 0x1ce   : > { %v1446_v7 = vpack.c.bf16 %v1147_v29, %v1146_v18  ;;  %v1145_v10 = vmax.f32 %v1117_v61, 0.0  ;;  %v1141_v12 = vadd.f32 %v1481_v5, %v1407_v24  ;;  %v1148_v28 = vmax.f32 %v1130_v11, 0.0 }
 0x1cf   : > { %v1132_v13 = vpop.f32.mrf.mxu1 }
 0x1d0   : > { %1458 = vst [vmem:[%s252_s16 + $0x8] sm:$0xff] %v1446_v7   ;;  %v1441_v25 = vpack.c.bf16 %v1145_v10, %v1144_v4  ;;  %v1151_v26 = vmax.f32 %v1141_v12, 0.0  ;;  %v1133_v27 = vadd.f32 %v1407_v24, %v1132_v13 }
 0x1d2   : > { %1442 = vst [vmem:[%s252_s16] sm:$0xff] %v1441_v25   ;;  %v1456_v43 = vpack.c.bf16 %v1151_v26, %v1150_v15  ;;  %v1149_v47 = vmax.f32 %v1133_v27, 0.0 }
 0x1d4   : > { %1460 = vst [vmem:[%s252_s16 + $0x18] sm:$0xff] %v1456_v43   ;;  %v1451_v48 = vpack.c.bf16 %v1149_v47, %v1148_v28 }
 0x1d6   : > { %1459 = vst [vmem:[%s252_s16 + $0x10] sm:$0xff] %v1451_v48  }
 0x1d7 PF: > { %s13_s14 = sadd.s32 1, %s1552_s14   ;;  %s2069_s12 = smov %s1548_s13 }
 0x1d8   : > { %p10_p5 = scmp.ge.s32.totalorder %s13_s14, 4   ;;  %s2070_s13 = smov %s2072_s15 }
 0x1da   :  { %12 = sbr.rel (!%p10_p5) target bundleno = 2 (0x2), region = 73 }

// kernel: basic_block_forward.3
= control target key start
LH: loop header
LB: loop body
LE: loop exit
PB: predicated region body
PF: predicated region fallthrough
CT: control target
= control target key end

     0   :  { %s3019_s15 = smov 0   ;;  %s3021_s16 = smov 0   ;;  %s3675_s0 = inlined_call_operand.vmem [shape: bf16[2,1,1,10,10,128], index: 0, kind: input, shape index: {}]   ;;  %s3676_s1 = inlined_call_operand.vmem [shape: bf16[2,1,64,4], index: 1, kind: input, shape index: {}]   ;;  %s3677_s2 = inlined_call_operand.vmem [shape: bf16[1156,128], index: 2, kind: input, shape index: {}]   ;;  %s3678_s3 = inlined_call_operand.vmem [shape: f32[1,128], index: 3, kind: input, shape index: {}]   ;;  %s3679_s4 = inlined_call_operand.vmem [shape: f32[2,1,64,128], index: 4, kind: output, shape index: {}]  }
   0x1   :  { %s3023_s17 = smov 0  }
   0x2 LB: > { %s33_s18 = sadd.s32 1, %s2987_s16  ;;  %p2401_p0 = scmp.ge.s32.totalorder %s2991_s17, 1  ;;  %s2991_s17 = sphi %s3023_s17, %s14_s17   ;;  %s2987_s16 = sphi %s3021_s16, %s3697_s16   ;;  %s2983_s15 = sphi %s3019_s15, %s3696_s15  }
   0x3   : > { %p35_p1 = scmp.ge.s32.totalorder %s33_s18, 2  ;;  %p224_p2 = scmp.lt.s32.totalorder %s2991_s17, 3 }
   0x5   : > { %s3699_s18 = smov (%p35_p1, %s33_s18), 0  ;;  %p225_p3 = pnand %p2401_p0, %p224_p2 }
   0x7   : > { %228 = sbr.rel (%p225_p3) target bundleno = 364 (0x16c), region = 36 }
   0xc   : > { %v2837_v0 = vld [vmem:[%s3677_s2 + $0x78] sm:$0xff]   ;;  %v2841_v4 = vld [vmem:[%s3677_s2 + $0x70] sm:$0xff]   ;;  %v2845_v8 = vld [vmem:[%s3677_s2 + $0x68] sm:$0xff]   ;;  %p277_p4 = scmp.lt.s32.totalorder %s2983_s15, 1  ;;  %vm510_vm0 = vcmask 1042432   ;;  %vm511_vm1 = vcmask 1046532  }
   0xd   : > { %v2838_v1 = vld [vmem:[%s3677_s2 + $0xf8] sm:$0xff]   ;;  %2633 = vmatprep.subr.bf16.mxu0 %v2837_v0  ;;  %v2842_v5 = vld [vmem:[%s3677_s2 + $0xf0] sm:$0xff]   ;;  %v2846_v9 = vld [vmem:[%s3677_s2 + $0xe8] sm:$0xff]   ;;  %vm347_vm2 = vsmask.f32 3328  ;;  %vm1896_vm6 = vcmask 1041408  }
   0xe   : > { %v2839_v2 = vld [vmem:[%s3677_s2 + $0x38] sm:$0xff]   ;;  %2673 = vmatprep.subr.bf16.mxu1 %v2838_v1  ;;  %v2843_v6 = vld [vmem:[%s3677_s2 + $0x30] sm:$0xff]   ;;  %v2847_v10 = vld [vmem:[%s3677_s2 + $0x28] sm:$0xff]   ;;  %s3701_s15 = smov (!%p277_p4, %s2983_s15), 1  ;;  %vm348_vm3 = vsmask.f32 7440 }
   0xf   : > { %v2840_v3 = vld [vmem:[%s3677_s2 + $0xb8] sm:$0xff]   ;;  %2634 = vmatpush3.bf16.msra.mxu0 %v2839_v2  ;;  %v2844_v7 = vld [vmem:[%s3677_s2 + $0xb0] sm:$0xff]   ;;  %v2848_v11 = vld [vmem:[%s3677_s2 + $0xa8] sm:$0xff]   ;;  %s2811_s27 = smul.u32 80, %s3701_s15  ;;  %s2631_s13 = sshll.u32 %s3701_s15, 5  ;;  %vm1051_vm7 = vcmask 27648  }
  0x10   : > { %2674 = vmatpush3.bf16.msra.mxu1 %v2840_v3  ;;  %2635 = vmatprep.subr.bf16.mxu0 %v2841_v4  ;;  %v2849_v12 = vld [vmem:[%s3677_s2 + $0x60] sm:$0xff]   ;;  %v2853_v16 = vld [vmem:[%s3677_s2 + $0x58] sm:$0xff]   ;;  %v2857_v20 = vld [vmem:[%s3677_s2 + $0x50] sm:$0xff]   ;;  %s3511_s22 = scalar_lea.vmem %s3676_s1, %s2631_s13  ;;  %vm1883_vm8 = vcmask 31744   ;;  %s2632_s24 = sshll.u32 %s3701_s15, 6 }
  0x11   : > { %2675 = vmatprep.subr.bf16.mxu1 %v2842_v5  ;;  %v2850_v13 = vld [vmem:[%s3677_s2 + $0xe0] sm:$0xff]   ;;  %v2854_v17 = vld [vmem:[%s3677_s2 + $0xd8] sm:$0xff]   ;;  %v2858_v21 = vld [vmem:[%s3677_s2 + $0xd0] sm:$0xff]   ;;  %s3137_s12 = scalar_lea.vmem %s3675_s0, %s2811_s27  ;;  %s3643_s26 = scalar_lea.vmem %s3679_s4, %s2632_s24 }
  0x12   : > { %v2851_v14 = vld [vmem:[%s3677_s2 + $0x20] sm:$0xff]   ;;  %v2855_v18 = vld [vmem:[%s3677_s2 + $0x18] sm:$0xff]   ;;  %v2859_v22 = vld [vmem:[%s3677_s2 + $0x10] sm:$0xff]  }
  0x13   : > { %2636 = vmatpush3.bf16.msra.mxu0 %v2843_v6  ;;  %v2852_v15 = vld [vmem:[%s3677_s2 + $0xa0] sm:$0xff]   ;;  %v2856_v19 = vld [vmem:[%s3677_s2 + $0x98] sm:$0xff]   ;;  %v2860_v23 = vld [vmem:[%s3677_s2 + $0x90] sm:$0xff]  }
  0x14   : > { %2676 = vmatpush3.bf16.msra.mxu1 %v2844_v7  ;;  %2637 = vmatprep.subr.bf16.mxu0 %v2845_v8  ;;  %v2861_v24 = vld [vmem:[%s3677_s2 + $0x48] sm:$0xff]   ;;  %v2865_v28 = vld [vmem:[%s3677_s2 + $0x40] sm:$0xff]   ;;  %vm3157_vm4 = vmor %vm510_vm0, %vm511_vm1 }
  0x15   : > { %2677 = vmatprep.subr.bf16.mxu1 %v2846_v9  ;;  %v2862_v25 = vld [vmem:[%s3677_s2 + $0xc8] sm:$0xff]   ;;  %v2866_v29 = vld [vmem:[%s3677_s2 + $0xc0] sm:$0xff]   ;;  %vm3163_vm5 = vmor %vm347_vm2, %vm348_vm3 }
  0x16   : > { %v2863_v26 = vld [vmem:[%s3677_s2 + $0x8] sm:$0xff]   ;;  %v2867_v30 = vld [vmem:[%s3677_s2] sm:$0xff]   ;;  %v2875_v61 = vld [vmem:[%s3677_s2 + $0x178] sm:$0xff]  }
  0x17   : > { %2638 = vmatpush3.bf16.msra.mxu0 %v2847_v10  ;;  %v2864_v27 = vld [vmem:[%s3677_s2 + $0x88] sm:$0xff]   ;;  %v2868_v31 = vld [vmem:[%s3677_s2 + $0x80] sm:$0xff]   ;;  %v2416_v0 = vld [vmem:[%s3137_s12 + $0x10] sm:$0xf] }
  0x18   : > { %2678 = vmatpush3.bf16.msra.mxu1 %v2848_v11  ;;  %2639 = vmatprep.subr.bf16.mxu0 %v2849_v12  ;;  %v315_v32 = vld [vmem:[%s3137_s12] sm:$0xf]  ;;  %v316_v33 = vld [vmem:[%s3137_s12 + $0x8] sm:$0xf]  ;;  %v332_v35 = vld [vmem:[%s3137_s12 + $0x4] sm:$0x1] }
  0x19   : > { %2679 = vmatprep.subr.bf16.mxu1 %v2850_v13  ;;  %v331_v34 = vld [vmem:[%s3137_s12] sm:$0xf]  ;;  %323 = vst [vmem:[#allocation2] sm:$0xf] %v315_v32  ;;  %324 = vst [vmem:[#allocation2 + $0x28] sm:$0xf] %v316_v33 }
  0x1a   : > { %v333_v36 = vld [vmem:[%s3137_s12 + $0x8] sm:$0xf]  ;;  %v334_v37 = vld [vmem:[%s3137_s12 + $0xc] sm:$0x1]  ;;  %v351_v38 = vshrl.u32 %v331_v34, 16  ;;  %v354_v39 = vshll.u32 %v331_v34, 16 }
  0x1b   : > { %2640 = vmatpush3.bf16.msra.mxu0 %v2851_v14  ;;  %v360_v40 = vshll.u32 %v332_v35, 16  ;;  %v365_v41 = vshrl.u32 %v333_v36, 16  ;;  %v368_v42 = vshll.u32 %v333_v36, 16  ;;  %v374_v43 = vshll.u32 %v334_v37, 16  ;;  %v478_v44 = vld [vmem:[%s3137_s12] sm:$0xe] }
  0x1c   : > { %2680 = vmatpush3.bf16.msra.mxu1 %v2852_v15  ;;  %2641 = vmatprep.subr.bf16.mxu0 %v2853_v16  ;;  %v353_v45 = vrot.slane %v351_v38, 4  ;;  %v356_v46 = vrot.slane %v354_v39, 5  ;;  %v479_v47 = vld [vmem:[%s3137_s12 + $0x4] sm:$0x1]  ;;  %v480_v48 = vld [vmem:[%s3137_s12 + $0x8] sm:$0xe] }
  0x1d   : > { %2681 = vmatprep.subr.bf16.mxu1 %v2854_v17  ;;  %v362_v49 = vrot.slane %v360_v40, 5  ;;  %v367_v50 = vrot.slane %v365_v41, 4  ;;  %v370_v51 = vrot.slane %v368_v42, 5  ;;  %v376_v52 = vrot.slane %v374_v43, 5  ;;  %v481_v53 = vld [vmem:[%s3137_s12 + $0xc] sm:$0x1] }
  0x1e   : > { %v357_v56 = vor.u32 %v356_v46, %v353_v45  ;;  %v2407_v57 = vrot.slane %v478_v44, 9  ;;  %v515_v58 = vrot.slane %v479_v47, 5  ;;  %v2408_v59 = vrot.slane %v480_v48, 9  ;;  %v2415_v60 = vld [vmem:[%s3137_s12 + $0x8] sm:$0xf]  ;;  %v2876_v1 = vld [vmem:[%s3677_s2 + $0x1f8] sm:$0xff]  }
  0x1f   : > { %2642 = vmatpush3.bf16.msra.mxu0 %v2855_v18  ;;  %v371_v62 = vor.u32 %v370_v51, %v367_v50  ;;  %v519_v63 = vrot.slane %v481_v53, 5  ;;  %570 = vst [vmem:[#allocation2 + $0xc] sm:$0xf] %v2415_v60  ;;  %571 = vst [vmem:[#allocation2 + $0x34] sm:$0xf] %v2416_v0  ;;  %v2878_v8 = vld [vmem:[%s3677_s2 + $0x1b8] sm:$0xff]  }
  0x20   : > { %2682 = vmatpush3.bf16.msra.mxu1 %v2856_v19  ;;  %2643 = vmatprep.subr.bf16.mxu0 %v2857_v20  ;;  %v358_v2 = vrot.slane %v357_v56, 4  ;;  %v516_v3 = vsel %vm3157_vm4, %v2407_v57, %v515_v58  ;;  %v317_v9 = vld [vmem:[%s3137_s12 + $0x10] sm:$0xf]  ;;  %v318_v10 = vld [vmem:[%s3137_s12 + $0x18] sm:$0xf]  ;;  %v2889_v48 = vld [vmem:[%s3677_s2 + $0x168] sm:$0xff]  }
  0x21   : > { %2683 = vmatprep.subr.bf16.mxu1 %v2858_v21  ;;  %v372_v4 = vrot.slane %v371_v62, 4  ;;  %v520_v5 = vsel %vm3157_vm4, %v2408_v59, %v519_v63  ;;  %553 = vst [vmem:[#allocation2 + $0x8] sm:$0xf] %v516_v3  ;;  %v335_v11 = vld [vmem:[%s3137_s12 + $0x10] sm:$0xf]  ;;  %v2877_v18 = vld [vmem:[%s3677_s2 + $0x138] sm:$0xff]  }
  0x22   : > { %v363_v6 = vsel %vm3163_vm5, %v358_v2, %v362_v49  ;;  %554 = vst [vmem:[#allocation2 + $0x30] sm:$0xf] %v520_v5  ;;  %v2880_v12 = vld [vmem:[%s3677_s2 + $0x1f0] sm:$0xff]   ;;  %325 = vst [vmem:[#allocation2 + $0x50] sm:$0xf] %v317_v9  ;;  %v379_v15 = vshrl.u32 %v335_v11, 16 }
  0x23   : > { %2644 = vmatpush3.bf16.msra.mxu0 %v2859_v22  ;;  %v377_v7 = vsel %vm3163_vm5, %v372_v4, %v376_v52  ;;  %470 = vst [vmem:[#allocation2 + $0x4] sm:$0xf] %v363_v6  ;;  %326 = vst [vmem:[#allocation2 + $0x78] sm:$0xf] %v318_v10  ;;  %v336_v13 = vld [vmem:[%s3137_s12 + $0x14] sm:$0x1] }
  0x24   : > { %2684 = vmatpush3.bf16.msra.mxu1 %v2860_v23  ;;  %2645 = vmatprep.subr.bf16.mxu0 %v2861_v24  ;;  %471 = vst [vmem:[#allocation2 + $0x2c] sm:$0xf] %v377_v7  ;;  %v337_v14 = vld [vmem:[%s3137_s12 + $0x18] sm:$0xf]  ;;  %v382_v19 = vshll.u32 %v335_v11, 16  ;;  %v2879_v20 = vld [vmem:[%s3677_s2 + $0x170] sm:$0xff]  }
  0x25   : > { %2685 = vmatprep.subr.bf16.mxu1 %v2862_v25  ;;  %v338_v21 = vld [vmem:[%s3137_s12 + $0x1c] sm:$0x1]  ;;  %v381_v22 = vrot.slane %v379_v15, 4  ;;  %v388_v23 = vshll.u32 %v336_v13, 16  ;;  %v393_v24 = vshrl.u32 %v337_v14, 16  ;;  %v2881_v34 = vld [vmem:[%s3677_s2 + $0x130] sm:$0xff]  }
  0x26   : > { %v2874_v17 = vld [vmem:[#allocation2 + $0xc] ss:$40 sps:$4 sm:$0xff]   ;;  %v2869_v25 = vld [vmem:[#allocation2] ss:$40 sps:$4 sm:$0xff]   ;;  %v402_v32 = vshll.u32 %v338_v21, 16 }
  0x27   : > { %2646 = vmatpush3.bf16.msra.mxu0 %v2863_v26  ;;  %1997 = vmatprep.mubr.bf16.mxu1 %v2874_v17  ;;  %v482_v33 = vld [vmem:[%s3137_s12 + $0x10] sm:$0xe]  ;;  %v483_v36 = vld [vmem:[%s3137_s12 + $0x14] sm:$0x1]  ;;  %v484_v37 = vld [vmem:[%s3137_s12 + $0x18] sm:$0xe] }
  0x28   : > { %2686 = vmatpush3.bf16.msra.mxu1 %v2864_v27  ;;  %2647 = vmatprep.subr.bf16.mxu0 %v2865_v28  ;;  %v2882_v27 = vld [vmem:[%s3677_s2 + $0x1b0] sm:$0xff]   ;;  %v384_v28 = vrot.slane %v382_v19, 5  ;;  %v485_v38 = vld [vmem:[%s3137_s12 + $0x1c] sm:$0x1]  ;;  %v404_v40 = vrot.slane %v402_v32, 5  ;;  %v2409_v41 = vrot.slane %v482_v33, 9 }
  0x29   : > { %2687 = vmatprep.subr.bf16.mxu1 %v2866_v29  ;;  %v2872_v16 = vld [vmem:[#allocation2 + $0x8] ss:$40 sps:$4 sm:$0xff]   ;;  %v390_v29 = vrot.slane %v388_v23, 5  ;;  %v523_v42 = vrot.slane %v483_v36, 5  ;;  %v2417_v43 = vld [vmem:[%s3137_s12 + $0x18] sm:$0xf] }
  0x2a   : > { %v385_v35 = vor.u32 %v384_v28, %v381_v22  ;;  %v2410_v45 = vrot.slane %v484_v37, 9  ;;  %v527_v46 = vrot.slane %v485_v38, 5  ;;  %v2418_v47 = vld [vmem:[%s3137_s12 + $0x20] sm:$0xf]  ;;  %572 = vst [vmem:[#allocation2 + $0x5c] sm:$0xf] %v2417_v43 }
  0x2b   : > { %2648 = vmatpush3.bf16.msra.mxu0 %v2867_v30  ;;  %v2871_v26 = vld [vmem:[#allocation2 + $0x4] ss:$40 sps:$4 sm:$0xff]   ;;  %v395_v30 = vrot.slane %v393_v24, 4  ;;  %v524_v50 = vsel %vm3157_vm4, %v2409_v41, %v523_v42  ;;  %573 = vst [vmem:[#allocation2 + $0x84] sm:$0xf] %v2418_v47  ;;  %v2903_v22 = vld [vmem:[%s3677_s2 + $0x158] sm:$0xff]  }
  0x2c   : > { %2688 = vmatpush3.bf16.msra.mxu1 %v2868_v31  ;;  %2713 = vmatprep.subr.bf16.mxu0 %v2875_v61  ;;  %v396_v31 = vshll.u32 %v337_v14, 16  ;;  %v386_v44 = vrot.slane %v385_v35, 4  ;;  %v528_v52 = vsel %vm3157_vm4, %v2410_v45, %v527_v46  ;;  %555 = vst [vmem:[#allocation2 + $0x58] sm:$0xf] %v524_v50  ;;  %v2890_v53 = vld [vmem:[%s3677_s2 + $0x1e8] sm:$0xff]   ;;  %v2893_v60 = vld [vmem:[%s3677_s2 + $0x160] sm:$0xff]  }
  0x2d   : > { %2753 = vmatprep.subr.bf16.mxu1 %v2876_v1  ;;  %1932 = vmatprep.mubr.bf16.mxu0 %v2871_v26  ;;  %556 = vst [vmem:[#allocation2 + $0x80] sm:$0xf] %v528_v52  ;;  %v2891_v57 = vld [vmem:[%s3677_s2 + $0x128] sm:$0xff]   ;;  %v2894_v61 = vld [vmem:[%s3677_s2 + $0x1e0] sm:$0xff]   ;;  %v2887_v15 = vld [vmem:[#allocation2 + $0x50] ss:$40 sps:$4 sm:$0xff]  }
  0x2e   : > { %1933 = vmatmul.mubr.bf16.vlgmr.msra.gmra.mxu0 %v2869_v25  ;;  %v398_v39 = vrot.slane %v396_v31, 5  ;;  %v391_v51 = vsel %vm3163_vm5, %v386_v44, %v390_v29  ;;  %v2892_v58 = vld [vmem:[%s3677_s2 + $0x1a8] sm:$0xff]   ;;  %v2895_v62 = vld [vmem:[%s3677_s2 + $0x120] sm:$0xff]   ;;  %v2420_v35 = vld [vmem:[%s3137_s12 + $0x30] sm:$0xf] }
  0x2f   : > { %1998 = vmatmul.mubr.bf16.vlgmr.msra.gmra.mxu1 %v2872_v16  ;;  %2714 = vmatpush3.bf16.msra.mxu0 %v2877_v18  ;;  %472 = vst [vmem:[#allocation2 + $0x54] sm:$0xf] %v391_v51  ;;  %v2896_v63 = vld [vmem:[%s3677_s2 + $0x1a0] sm:$0xff]   ;;  %v320_v1 = vld [vmem:[%s3137_s12 + $0x28] sm:$0xf]  ;;  %v2904_v36 = vld [vmem:[%s3677_s2 + $0x1d8] sm:$0xff]  }
  0x30   : > { %2754 = vmatpush3.bf16.msra.mxu1 %v2878_v8  ;;  %2715 = vmatprep.subr.bf16.mxu0 %v2879_v20  ;;  %v399_v49 = vor.u32 %v398_v39, %v395_v30  ;;  %v319_v0 = vld [vmem:[%s3137_s12 + $0x20] sm:$0xf]  ;;  %328 = vst [vmem:[#allocation2 + $0xc8] sm:$0xf] %v320_v1  ;;  %v340_v7 = vld [vmem:[%s3137_s12 + $0x24] sm:$0x1] }
  0x31   : > { %2755 = vmatprep.subr.bf16.mxu1 %v2880_v12  ;;  %327 = vst [vmem:[#allocation2 + $0xa0] sm:$0xf] %v319_v0  ;;  %v339_v2 = vld [vmem:[%s3137_s12 + $0x20] sm:$0xf]  ;;  %v341_v8 = vld [vmem:[%s3137_s12 + $0x28] sm:$0xf] }
  0x32   : > { %v400_v56 = vrot.slane %v399_v49, 4  ;;  %v2885_v3 = vld [vmem:[#allocation2 + $0x5c] ss:$40 sps:$4 sm:$0xff]   ;;  %v407_v4 = vshrl.u32 %v339_v2, 16  ;;  %v410_v5 = vshll.u32 %v339_v2, 16  ;;  %v416_v12 = vshll.u32 %v340_v7, 16 }
  0x33   : > { %2716 = vmatpush3.bf16.msra.mxu0 %v2881_v34  ;;  %2005 = vmatprep.mubr.bf16.mxu1 %v2885_v3  ;;  %v342_v9 = vld [vmem:[%s3137_s12 + $0x2c] sm:$0x1]  ;;  %v421_v13 = vshrl.u32 %v341_v8, 16  ;;  %v424_v16 = vshll.u32 %v341_v8, 16  ;;  %v486_v21 = vld [vmem:[%s3137_s12 + $0x20] sm:$0xe] }
  0x34   : > { %2756 = vmatpush3.bf16.msra.mxu1 %v2882_v27  ;;  %v405_v59 = vsel %vm3163_vm5, %v400_v56, %v404_v40  ;;  %2717 = vmatprep.subr.bf16.mxu0 %v2889_v48  ;;  %v2888_v6 = vld [vmem:[#allocation2 + $0x58] ss:$40 sps:$4 sm:$0xff]   ;;  %v409_v10 = vrot.slane %v407_v4, 4  ;;  %v412_v11 = vrot.slane %v410_v5, 5  ;;  %v418_v18 = vrot.slane %v416_v12, 5  ;;  %v2907_v44 = vld [vmem:[%s3677_s2 + $0x150] sm:$0xff]  }
  0x35   : > { %2757 = vmatprep.subr.bf16.mxu1 %v2890_v53  ;;  %473 = vst [vmem:[#allocation2 + $0x7c] sm:$0xf] %v405_v59  ;;  %v423_v19 = vrot.slane %v421_v13, 4  ;;  %v430_v20 = vshll.u32 %v342_v9, 16  ;;  %v426_v23 = vrot.slane %v424_v16, 5  ;;  %v2411_v26 = vrot.slane %v486_v21, 9 }
  0x36   : > { %v413_v17 = vor.u32 %v412_v11, %v409_v10  ;;  %v487_v24 = vld [vmem:[%s3137_s12 + $0x24] sm:$0x1]  ;;  %v488_v25 = vld [vmem:[%s3137_s12 + $0x28] sm:$0xe]  ;;  %v489_v29 = vld [vmem:[%s3137_s12 + $0x2c] sm:$0x1] }
  0x37   : > { %2718 = vmatpush3.bf16.msra.mxu0 %v2891_v57  ;;  %2006 = vmatmul.mubr.bf16.gmra.mxu1 %v2888_v6  ;;  %v432_v28 = vrot.slane %v430_v20, 5  ;;  %v531_v30 = vrot.slane %v487_v24, 5  ;;  %v2412_v31 = vrot.slane %v488_v25, 9  ;;  %v427_v32 = vor.u32 %v426_v23, %v423_v19  ;;  %v2419_v34 = vld [vmem:[%s3137_s12 + $0x28] sm:$0xf]  ;;  %v2905_v41 = vld [vmem:[%s3677_s2 + $0x118] sm:$0xff]  }
  0x38   : > { %2758 = vmatpush3.bf16.msra.mxu1 %v2892_v58  ;;  %2719 = vmatprep.subr.bf16.mxu0 %v2893_v60  ;;  %v414_v27 = vrot.slane %v413_v17, 4  ;;  %v535_v33 = vrot.slane %v489_v29, 5  ;;  %574 = vst [vmem:[#allocation2 + $0xac] sm:$0xf] %v2419_v34  ;;  %575 = vst [vmem:[#allocation2 + $0xd4] sm:$0xf] %v2420_v35 }
  0x39   : > { %2759 = vmatprep.subr.bf16.mxu1 %v2894_v61  ;;  %v532_v38 = vsel %vm3157_vm4, %v2411_v26, %v531_v30  ;;  %v428_v39 = vrot.slane %v427_v32, 4  ;;  %v2906_v43 = vld [vmem:[%s3677_s2 + $0x198] sm:$0xff]   ;;  %v2908_v45 = vld [vmem:[%s3677_s2 + $0x1d0] sm:$0xff]   ;;  %v2901_v60 = vld [vmem:[#allocation2 + $0xa0] ss:$40 sps:$4 sm:$0xff]  }
  0x3a   : > { %v419_v37 = vsel %vm3163_vm5, %v414_v27, %v418_v18  ;;  %v536_v40 = vsel %vm3157_vm4, %v2412_v31, %v535_v33  ;;  %557 = vst [vmem:[#allocation2 + $0xa8] sm:$0xf] %v532_v38  ;;  %v2909_v46 = vld [vmem:[%s3677_s2 + $0x110] sm:$0xff]   ;;  %v322_v49 = vld [vmem:[%s3137_s12 + $0x38] sm:$0xf]  ;;  %v2918_v25 = vld [vmem:[%s3677_s2 + $0x1c8] sm:$0xff]  }
  0x3b   : > { %2720 = vmatpush3.bf16.msra.mxu0 %v2895_v62  ;;  %474 = vst [vmem:[#allocation2 + $0xa4] sm:$0xf] %v419_v37  ;;  %558 = vst [vmem:[#allocation2 + $0xd0] sm:$0xf] %v536_v40  ;;  %v433_v42 = vsel %vm3163_vm5, %v428_v39, %v432_v28  ;;  %v2910_v47 = vld [vmem:[%s3677_s2 + $0x190] sm:$0xff]   ;;  %v2919_v26 = vld [vmem:[%s3677_s2 + $0x108] sm:$0xff]  }
  0x3c   : > { %2760 = vmatpush3.bf16.msra.mxu1 %v2896_v63  ;;  %v2883_v14 = vld [vmem:[#allocation2 + $0x54] ss:$40 sps:$4 sm:$0xff]   ;;  %2721 = vmatprep.subr.bf16.mxu0 %v2903_v22  ;;  %475 = vst [vmem:[#allocation2 + $0xcc] sm:$0xf] %v433_v42  ;;  %v321_v48 = vld [vmem:[%s3137_s12 + $0x30] sm:$0xf] }
  0x3d   : > { %1940 = vmatprep.mubr.bf16.mxu0 %v2883_v14  ;;  %2761 = vmatprep.subr.bf16.mxu1 %v2904_v36  ;;  %329 = vst [vmem:[#allocation2 + $0xf0] sm:$0xf] %v321_v48  ;;  %330 = vst [vmem:[#allocation2 + $0x118] sm:$0xf] %v322_v49  ;;  %v343_v50 = vld [vmem:[%s3137_s12 + $0x30] sm:$0xf] }
  0x3e   : > { %1941 = vmatmul.mubr.bf16.gmra.mxu0 %v2887_v15  ;;  %v435_v53 = vshrl.u32 %v343_v50, 16  ;;  %v344_v56 = vld [vmem:[%s3137_s12 + $0x34] sm:$0x1]  ;;  %v345_v57 = vld [vmem:[%s3137_s12 + $0x38] sm:$0xf]  ;;  %v438_v62 = vshll.u32 %v343_v50, 16 }
  0x3f   : > { %2722 = vmatpush3.bf16.msra.mxu0 %v2905_v41  ;;  %v2899_v51 = vld [vmem:[#allocation2 + $0xac] ss:$40 sps:$4 sm:$0xff]   ;;  %v346_v58 = vld [vmem:[%s3137_s12 + $0x3c] sm:$0x1]  ;;  %v444_v63 = vshll.u32 %v344_v56, 16  ;;  %v449_v0 = vshrl.u32 %v345_v57, 16 }
  0x40   : > { %2762 = vmatpush3.bf16.msra.mxu1 %v2906_v43  ;;  %2723 = vmatprep.subr.bf16.mxu0 %v2907_v44  ;;  %v437_v61 = vrot.slane %v435_v53, 4  ;;  %v452_v1 = vshll.u32 %v345_v57, 16  ;;  %v490_v2 = vld [vmem:[%s3137_s12 + $0x30] sm:$0xe]  ;;  %v458_v3 = vshll.u32 %v346_v58, 16  ;;  %v440_v7 = vrot.slane %v438_v62, 5 }
  0x41   : > { %2763 = vmatprep.subr.bf16.mxu1 %v2908_v45  ;;  %2013 = vmatprep.mubr.bf16.mxu1 %v2899_v51  ;;  %v491_v4 = vld [vmem:[%s3137_s12 + $0x34] sm:$0x1]  ;;  %v492_v5 = vld [vmem:[%s3137_s12 + $0x38] sm:$0xe]  ;;  %v2413_v6 = vrot.slane %v490_v2, 9  ;;  %v446_v8 = vrot.slane %v444_v63, 5 }
  0x42   : > { %v2902_v52 = vld [vmem:[#allocation2 + $0xa8] ss:$40 sps:$4 sm:$0xff]   ;;  %v451_v9 = vrot.slane %v449_v0, 4  ;;  %v454_v10 = vrot.slane %v452_v1, 5  ;;  %v493_v11 = vld [vmem:[%s3137_s12 + $0x3c] sm:$0x1]  ;;  %v441_v17 = vor.u32 %v440_v7, %v437_v61 }
  0x43   : > { %2724 = vmatpush3.bf16.msra.mxu0 %v2909_v46  ;;  %v2897_v59 = vld [vmem:[#allocation2 + $0xa4] ss:$40 sps:$4 sm:$0xff]   ;;  %2014 = vmatmul.mubr.bf16.gmra.mxu1 %v2902_v52  ;;  %v460_v12 = vrot.slane %v458_v3, 5  ;;  %v539_v13 = vrot.slane %v491_v4, 5  ;;  %v2414_v14 = vrot.slane %v492_v5, 9  ;;  %v543_v15 = vrot.slane %v493_v11, 5 }
  0x44   : > { %2764 = vmatpush3.bf16.msra.mxu1 %v2910_v47  ;;  %1948 = vmatprep.mubr.bf16.mxu0 %v2897_v59  ;;  %v2421_v16 = vld [vmem:[%s3137_s12 + $0x38] sm:$0xf]  ;;  %v455_v18 = vor.u32 %v454_v10, %v451_v9  ;;  %v2422_v19 = vld [vmem:[%s3137_s12 + $0x40] sm:$0xf]  ;;  %v2917_v22 = vld [vmem:[%s3677_s2 + $0x148] sm:$0xff]   ;;  %v442_v23 = vrot.slane %v441_v17, 4 }
  0x45   : > { %576 = vst [vmem:[#allocation2 + $0xfc] sm:$0xf] %v2421_v16  ;;  %v540_v20 = vsel %vm3157_vm4, %v2413_v6, %v539_v13  ;;  %v544_v21 = vsel %vm3157_vm4, %v2414_v14, %v543_v15  ;;  %577 = vst [vmem:[#allocation2 + $0x124] sm:$0xf] %v2422_v19  ;;  %2725 = vmatprep.subr.bf16.mxu0 %v2917_v22  ;;  %2765 = vmatprep.subr.bf16.mxu1 %v2918_v25  ;;  %v2920_v29 = vld [vmem:[%s3677_s2 + $0x188] sm:$0xff]   ;;  %v2921_v30 = vld [vmem:[%s3677_s2 + $0x140] sm:$0xff]  }
  0x46   : > { %1949 = vmatmul.mubr.bf16.gmra.mxu0 %v2901_v60  ;;  %v456_v24 = vrot.slane %v455_v18, 4  ;;  %559 = vst [vmem:[#allocation2 + $0xf8] sm:$0xf] %v540_v20  ;;  %560 = vst [vmem:[#allocation2 + $0x120] sm:$0xf] %v544_v21  ;;  %v447_v27 = vsel %vm3163_vm5, %v442_v23, %v446_v8  ;;  %v2922_v31 = vld [vmem:[%s3677_s2 + $0x1c0] sm:$0xff]  }
  0x47   : > { %2726 = vmatpush3.bf16.msra.mxu0 %v2919_v26  ;;  %476 = vst [vmem:[#allocation2 + $0xf4] sm:$0xf] %v447_v27  ;;  %v2923_v32 = vld [vmem:[%s3677_s2 + $0x100] sm:$0xff]   ;;  %v2423_v34 = vld [vmem:[%s3137_s12 + $0x8] sm:$0xf]  ;;  %v2993_v42 = vmov 0  }
  0x48   : > { %v461_v28 = vsel %vm3163_vm5, %v456_v24, %v460_v12  ;;  %2766 = vmatpush3.bf16.msra.mxu1 %v2920_v29  ;;  %2727 = vmatprep.subr.bf16.mxu0 %v2921_v30  ;;  %v2924_v33 = vld [vmem:[%s3677_s2 + $0x180] sm:$0xff]   ;;  %v2424_v35 = vld [vmem:[%s3137_s12 + $0xc] sm:$0x1]  ;;  %v595_v37 = vshrl.u32 %v2423_v34, 16  ;;  %v598_v38 = vshll.u32 %v2423_v34, 16 }
  0x49   : > { %477 = vst [vmem:[#allocation2 + $0x11c] sm:$0xf] %v461_v28  ;;  %2767 = vmatprep.subr.bf16.mxu1 %v2922_v31  ;;  %v2425_v40 = vld [vmem:[%s3137_s12 + $0x10] sm:$0xf]  ;;  %v2426_v41 = vld [vmem:[%s3137_s12 + $0x14] sm:$0x1] }
  0x4a   : > { %v597_v43 = vrot.slane %v595_v37, 4  ;;  %v600_v44 = vrot.slane %v598_v38, 5  ;;  %v604_v45 = vshll.u32 %v2424_v35, 16  ;;  %v609_v46 = vshrl.u32 %v2425_v40, 16  ;;  %v2439_v47 = vld [vmem:[%s3137_s12 + $0x8] sm:$0xe] }
  0x4b   : > { %2728 = vmatpush3.bf16.msra.mxu0 %v2923_v32  ;;  %v612_v49 = vshll.u32 %v2425_v40, 16  ;;  %v618_v50 = vshll.u32 %v2426_v41, 16  ;;  %v2915_v51 = vld [vmem:[#allocation2 + $0xf0] ss:$40 sps:$4 sm:$0xff]   ;;  %v2440_v57 = vld [vmem:[%s3137_s12 + $0xc] sm:$0x1] }
  0x4c   : > { %v2913_v36 = vld [vmem:[#allocation2 + $0xfc] ss:$40 sps:$4 sm:$0xff]   ;;  %2768 = vmatpush3.bf16.msra.mxu1 %v2924_v33  ;;  %2160 = vmatprep.subr.bf16.mxu0 %v2993_v42  ;;  %v601_v52 = vor.u32 %v600_v44, %v597_v43  ;;  %v606_v53 = vrot.slane %v604_v45, 5  ;;  %v611_v56 = vrot.slane %v609_v46, 4  ;;  %v2441_v59 = vld [vmem:[%s3137_s12 + $0x10] sm:$0xe] }
  0x4d   : > { %v2916_v39 = vld [vmem:[#allocation2 + $0xf8] ss:$40 sps:$4 sm:$0xff]   ;;  %2021 = vmatprep.mubr.bf16.mxu1 %v2913_v36  ;;  %2793 = vmatprep.subr.bf16.mxu1 %v2993_v42  ;;  %v614_v58 = vrot.slane %v612_v49, 5  ;;  %v2442_v60 = vld [vmem:[%s3137_s12 + $0x14] sm:$0x1]  ;;  %v2455_v62 = vrot.slane %v2439_v47, 9 }
  0x4e   : > { %2022 = vmatmul.mubr.bf16.gmra.mxu1 %v2916_v39  ;;  %v602_v61 = vrot.slane %v601_v52, 4  ;;  %v756_v63 = vrot.slane %v2440_v57, 5  ;;  %v2456_v0 = vrot.slane %v2441_v59, 9  ;;  %v2463_v1 = vld [vmem:[%s3137_s12 + $0x10] sm:$0xf]  ;;  %v620_v3 = vrot.slane %v618_v50, 5 }
  0x4f   : > { %v615_v2 = vor.u32 %v614_v58, %v611_v56  ;;  %v760_v4 = vrot.slane %v2442_v60, 5  ;;  %v2464_v5 = vld [vmem:[%s3137_s12 + $0x18] sm:$0xf]  ;;  %811 = vst [vmem:[#allocation2 + $0x18] sm:$0xf] %v2463_v1 }
  0x50   : > { %v2911_v48 = vld [vmem:[#allocation2 + $0xf4] ss:$40 sps:$4 sm:$0xff]   ;;  %v2471_v6 = vld [vmem:[%s3137_s12 + $0x10] sm:$0xf]  ;;  %v607_v7 = vsel %vm3163_vm5, %v602_v61, %v606_v53  ;;  %v757_v8 = vsel %vm3157_vm4, %v2455_v62, %v756_v63  ;;  %812 = vst [vmem:[#allocation2 + $0x40] sm:$0xf] %v2464_v5 }
  0x51   : > { %1956 = vmatprep.mubr.bf16.mxu0 %v2911_v48  ;;  %v2472_v9 = vld [vmem:[%s3137_s12 + $0x14] sm:$0x1]  ;;  %v2473_v10 = vld [vmem:[%s3137_s12 + $0x18] sm:$0xf]  ;;  %v2474_v11 = vld [vmem:[%s3137_s12 + $0x1c] sm:$0x1]  ;;  %v761_v13 = vsel %vm3157_vm4, %v2456_v0, %v760_v4 }
  0x52   : > { %1957 = vmatmul.mubr.bf16.gmra.mxu0 %v2915_v51  ;;  %v616_v12 = vrot.slane %v615_v2, 4  ;;  %714 = vst [vmem:[#allocation2 + $0x10] sm:$0xf] %v607_v7  ;;  %794 = vst [vmem:[#allocation2 + $0x14] sm:$0xf] %v757_v8  ;;  %v836_v14 = vshrl.u32 %v2471_v6, 16 }
  0x53   : > { %v839_v15 = vshll.u32 %v2471_v6, 16  ;;  %795 = vst [vmem:[#allocation2 + $0x3c] sm:$0xf] %v761_v13  ;;  %v845_v16 = vshll.u32 %v2472_v9, 16  ;;  %v850_v17 = vshrl.u32 %v2473_v10, 16  ;;  %v853_v18 = vshll.u32 %v2473_v10, 16 }
  0x54   : > { %v859_v19 = vshll.u32 %v2474_v11, 16  ;;  %v621_v20 = vsel %vm3163_vm5, %v616_v12, %v620_v3  ;;  %v838_v21 = vrot.slane %v836_v14, 4  ;;  %v2427_v27 = vld [vmem:[%s3137_s12 + $0x18] sm:$0xf]  ;;  %v2428_v29 = vld [vmem:[%s3137_s12 + $0x1c] sm:$0x1] }
  0x55   : > { %v841_v22 = vrot.slane %v839_v15, 5  ;;  %715 = vst [vmem:[#allocation2 + $0x38] sm:$0xf] %v621_v20  ;;  %v847_v23 = vrot.slane %v845_v16, 5  ;;  %v852_v24 = vrot.slane %v850_v17, 4  ;;  %v855_v25 = vrot.slane %v853_v18, 5 }
  0x56   : > { %v861_v26 = vrot.slane %v859_v19, 5  ;;  %v2429_v30 = vld [vmem:[%s3137_s12 + $0x20] sm:$0xf]  ;;  %v2430_v31 = vld [vmem:[%s3137_s12 + $0x24] sm:$0x1]  ;;  %v623_v33 = vshrl.u32 %v2427_v27, 16 }
  0x57   : > { %v842_v28 = vor.u32 %v841_v22, %v838_v21  ;;  %v856_v32 = vor.u32 %v855_v25, %v852_v24  ;;  %v626_v34 = vshll.u32 %v2427_v27, 16  ;;  %v632_v35 = vshll.u32 %v2428_v29, 16  ;;  %v2443_v36 = vld [vmem:[%s3137_s12 + $0x18] sm:$0xe]  ;;  %v2444_v41 = vld [vmem:[%s3137_s12 + $0x1c] sm:$0x1] }
  0x58   : > { %v637_v38 = vshrl.u32 %v2429_v30, 16  ;;  %v640_v39 = vshll.u32 %v2429_v30, 16  ;;  %v646_v40 = vshll.u32 %v2430_v31, 16  ;;  %v625_v44 = vrot.slane %v623_v33, 4  ;;  %v3368_v48 = vld [vmem:[%s3677_s2 + $0x238] sm:$0xff]   ;;  %v3390_v15 = vld [vmem:[%s3677_s2 + $0x230] sm:$0xff]  }
  0x59   : > { %v843_v37 = vrot.slane %v842_v28, 4  ;;  %v857_v43 = vrot.slane %v856_v32, 4  ;;  %v628_v45 = vrot.slane %v626_v34, 5  ;;  %v634_v46 = vrot.slane %v632_v35, 5  ;;  %v2445_v52 = vld [vmem:[%s3137_s12 + $0x20] sm:$0xe] }
  0x5a   : > { %v639_v49 = vrot.slane %v637_v38, 4  ;;  %v642_v50 = vrot.slane %v640_v39, 5  ;;  %v648_v51 = vrot.slane %v646_v40, 5  ;;  %v2446_v57 = vld [vmem:[%s3137_s12 + $0x24] sm:$0x1]  ;;  %v2457_v58 = vrot.slane %v2443_v36, 9 }
  0x5b   : > { %v848_v47 = vsel %vm3163_vm5, %v843_v37, %v847_v23  ;;  %v862_v53 = vsel %vm3163_vm5, %v857_v43, %v861_v26  ;;  %v629_v56 = vor.u32 %v628_v45, %v625_v44  ;;  %v764_v59 = vrot.slane %v2444_v41, 5  ;;  %v2465_v60 = vld [vmem:[%s3137_s12 + $0x20] sm:$0xf]  ;;  %v2927_v62 = vld [vmem:[#allocation2 + $0x14] ss:$40 sps:$4 sm:$0xff]   ;;  %v3398_v25 = vld [vmem:[%s3677_s2 + $0x228] sm:$0xff]  }
  0x5c   : > { %955 = vst [vmem:[#allocation2 + $0x1c] sm:$0xf] %v848_v47  ;;  %v2925_v61 = vld [vmem:[#allocation2 + $0x10] ss:$40 sps:$4 sm:$0xff]   ;;  %956 = vst [vmem:[#allocation2 + $0x44] sm:$0xf] %v862_v53  ;;  %v643_v63 = vor.u32 %v642_v50, %v639_v49  ;;  %2062 = vmatprep.mubr.bf16.mxu0 %v2927_v62 }
  0x5d   : > { %v2458_v0 = vrot.slane %v2445_v52, 9  ;;  %813 = vst [vmem:[#allocation2 + $0x68] sm:$0xf] %v2465_v60  ;;  %v630_v1 = vrot.slane %v629_v56, 4  ;;  %v765_v2 = vsel %vm3157_vm4, %v2457_v58, %v764_v59  ;;  %v768_v3 = vrot.slane %v2446_v57, 5  ;;  %2063 = vmatmul.mubr.bf16.vlgmr.msra.gmra.mxu0 %v2925_v61  ;;  %v3409_v40 = vld [vmem:[%s3677_s2 + $0x220] sm:$0xff]  }
  0x5e   : > { %v2466_v4 = vld [vmem:[%s3137_s12 + $0x28] sm:$0xf]  ;;  %v2475_v5 = vld [vmem:[%s3137_s12 + $0x20] sm:$0xf]  ;;  %v644_v6 = vrot.slane %v643_v63, 4  ;;  %2161 = vmatpush1.bf16.msra.mxu0 %v3368_v48 }
  0x5f   : > { %796 = vst [vmem:[#allocation2 + $0x64] sm:$0xf] %v765_v2  ;;  %814 = vst [vmem:[#allocation2 + $0x90] sm:$0xf] %v2466_v4  ;;  %v2476_v7 = vld [vmem:[%s3137_s12 + $0x24] sm:$0x1]  ;;  %v635_v10 = vsel %vm3163_vm5, %v630_v1, %v634_v46  ;;  %v769_v11 = vsel %vm3157_vm4, %v2458_v0, %v768_v3  ;;  %2162 = vmatprep.subr.bf16.mxu0 %v2993_v42 }
  0x60   : > { %v2477_v8 = vld [vmem:[%s3137_s12 + $0x28] sm:$0xf]  ;;  %v864_v9 = vshrl.u32 %v2475_v5, 16  ;;  %v2478_v12 = vld [vmem:[%s3137_s12 + $0x2c] sm:$0x1]  ;;  %v867_v13 = vshll.u32 %v2475_v5, 16  ;;  %v649_v16 = vsel %vm3163_vm5, %v644_v6, %v648_v51 }
  0x61   : > { %v873_v14 = vshll.u32 %v2476_v7, 16  ;;  %716 = vst [vmem:[#allocation2 + $0x60] sm:$0xf] %v635_v10  ;;  %797 = vst [vmem:[#allocation2 + $0x8c] sm:$0xf] %v769_v11  ;;  %v878_v18 = vshrl.u32 %v2477_v8, 16 }
  0x62   : > { %v866_v17 = vrot.slane %v864_v9, 4  ;;  %v881_v19 = vshll.u32 %v2477_v8, 16  ;;  %717 = vst [vmem:[#allocation2 + $0x88] sm:$0xf] %v649_v16  ;;  %v869_v20 = vrot.slane %v867_v13, 5  ;;  %v887_v21 = vshll.u32 %v2478_v12, 16  ;;  %2163 = vmatpush1.bf16.msra.mxu0 %v3390_v15 }
  0x63   : > { %v875_v22 = vrot.slane %v873_v14, 5  ;;  %v880_v23 = vrot.slane %v878_v18, 4  ;;  %v2928_v26 = vld [vmem:[#allocation2 + $0x18] ss:$40 sps:$4 sm:$0xff]   ;;  %v2930_v27 = vld [vmem:[#allocation2 + $0x1c] ss:$40 sps:$4 sm:$0xff]   ;;  %2164 = vmatprep.subr.bf16.mxu0 %v2993_v42 }
  0x64   : > { %v883_v24 = vrot.slane %v881_v19, 5  ;;  %v870_v28 = vor.u32 %v869_v20, %v866_v17  ;;  %v889_v29 = vrot.slane %v887_v21, 5  ;;  %v2431_v31 = vld [vmem:[%s3137_s12 + $0x28] sm:$0xf]  ;;  %v2432_v32 = vld [vmem:[%s3137_s12 + $0x2c] sm:$0x1]  ;;  %2127 = vmatprep.mubr.bf16.mxu1 %v2930_v27 }
  0x65   : > { %v2433_v33 = vld [vmem:[%s3137_s12 + $0x30] sm:$0xf]  ;;  %v2434_v35 = vld [vmem:[%s3137_s12 + $0x34] sm:$0x1]  ;;  %v651_v36 = vshrl.u32 %v2431_v31, 16  ;;  %v654_v37 = vshll.u32 %v2431_v31, 16  ;;  %2128 = vmatmul.mubr.bf16.vlgmr.msra.gmra.mxu1 %v2928_v26 }
  0x66   : > { %v884_v30 = vor.u32 %v883_v24, %v880_v23  ;;  %v871_v34 = vrot.slane %v870_v28, 4  ;;  %v660_v38 = vshll.u32 %v2432_v32, 16  ;;  %v665_v41 = vshrl.u32 %v2433_v33, 16  ;;  %v2447_v44 = vld [vmem:[%s3137_s12 + $0x28] sm:$0xe]  ;;  %2802 = vmatpush1.bf16.msra.mxu1 %v3368_v48  ;;  %2165 = vmatpush1.bf16.msra.mxu0 %v3398_v25  ;;  %v3427_v2 = vld [vmem:[%s3677_s2 + $0x218] sm:$0xff]  }
  0x67   : > { %v668_v43 = vshll.u32 %v2433_v33, 16  ;;  %v653_v46 = vrot.slane %v651_v36, 4  ;;  %v656_v47 = vrot.slane %v654_v37, 5  ;;  %v674_v49 = vshll.u32 %v2434_v35, 16  ;;  %v2448_v50 = vld [vmem:[%s3137_s12 + $0x2c] sm:$0x1]  ;;  %2794 = vmatprep.subr.bf16.mxu1 %v2993_v42  ;;  %2166 = vmatprep.subr.bf16.mxu0 %v2993_v42 }
  0x68   : > { %v885_v39 = vrot.slane %v884_v30, 4  ;;  %v876_v45 = vsel %vm3163_vm5, %v871_v34, %v875_v22  ;;  %v2933_v51 = vld [vmem:[#allocation2 + $0x64] ss:$40 sps:$4 sm:$0xff]   ;;  %v667_v48 = vrot.slane %v665_v41, 4  ;;  %v662_v57 = vrot.slane %v660_v38, 5  ;;  %v3450_v24 = vld [vmem:[%s3677_s2 + $0x210] sm:$0xff]  }
  0x69   : > { %957 = vst [vmem:[#allocation2 + $0x6c] sm:$0xf] %v876_v45  ;;  %v2937_v53 = vld [vmem:[#allocation2 + $0x60] ss:$40 sps:$4 sm:$0xff]   ;;  %v657_v56 = vor.u32 %v656_v47, %v653_v46  ;;  %v670_v58 = vrot.slane %v668_v43, 5  ;;  %2070 = vmatprep.mubr.bf16.mxu0 %v2933_v51  ;;  %v2459_v61 = vrot.slane %v2447_v44, 9 }
  0x6a   : > { %v890_v52 = vsel %vm3163_vm5, %v885_v39, %v889_v29  ;;  %v2449_v59 = vld [vmem:[%s3137_s12 + $0x30] sm:$0xe]  ;;  %v2450_v60 = vld [vmem:[%s3137_s12 + $0x34] sm:$0x1]  ;;  %v772_v62 = vrot.slane %v2448_v50, 5  ;;  %2803 = vmatpush1.bf16.msra.mxu1 %v3390_v15  ;;  %2071 = vmatmul.mubr.bf16.gmra.mxu0 %v2937_v53  ;;  %v676_v5 = vrot.slane %v674_v49, 5 }
  0x6b   : > { %958 = vst [vmem:[#allocation2 + $0x94] sm:$0xf] %v890_v52  ;;  %v2460_v63 = vrot.slane %v2449_v59, 9  ;;  %v776_v0 = vrot.slane %v2450_v60, 5  ;;  %v2467_v1 = vld [vmem:[%s3137_s12 + $0x30] sm:$0xf]  ;;  %v671_v4 = vor.u32 %v670_v58, %v667_v48  ;;  %2795 = vmatprep.subr.bf16.mxu1 %v2993_v42  ;;  %2167 = vmatpush1.bf16.msra.mxu0 %v3409_v40 }
  0x6c   : > { %v658_v3 = vrot.slane %v657_v56, 4  ;;  %v2468_v6 = vld [vmem:[%s3137_s12 + $0x38] sm:$0xf]  ;;  %815 = vst [vmem:[#allocation2 + $0xb8] sm:$0xf] %v2467_v1  ;;  %v773_v8 = vsel %vm3157_vm4, %v2459_v61, %v772_v62  ;;  %2168 = vmatprep.subr.bf16.mxu0 %v2993_v42  ;;  %v3462_v41 = vld [vmem:[%s3677_s2 + $0x208] sm:$0xff]  }
  0x6d   : > { %v2479_v7 = vld [vmem:[%s3137_s12 + $0x30] sm:$0xf]  ;;  %v777_v9 = vsel %vm3157_vm4, %v2460_v63, %v776_v0  ;;  %816 = vst [vmem:[#allocation2 + $0xe0] sm:$0xf] %v2468_v6  ;;  %v2480_v10 = vld [vmem:[%s3137_s12 + $0x34] sm:$0x1] }
  0x6e   : > { %v2481_v11 = vld [vmem:[%s3137_s12 + $0x38] sm:$0xf]  ;;  %v2482_v12 = vld [vmem:[%s3137_s12 + $0x3c] sm:$0x1]  ;;  %v663_v13 = vsel %vm3163_vm5, %v658_v3, %v662_v57  ;;  %v672_v14 = vrot.slane %v671_v4, 4  ;;  %v892_v15 = vshrl.u32 %v2479_v7, 16  ;;  %2804 = vmatpush1.bf16.msra.mxu1 %v3398_v25 }
  0x6f   : > { %798 = vst [vmem:[#allocation2 + $0xb4] sm:$0xf] %v773_v8  ;;  %799 = vst [vmem:[#allocation2 + $0xdc] sm:$0xf] %v777_v9  ;;  %v895_v16 = vshll.u32 %v2479_v7, 16  ;;  %v901_v17 = vshll.u32 %v2480_v10, 16  ;;  %2796 = vmatprep.subr.bf16.mxu1 %v2993_v42  ;;  %2169 = vmatpush1.bf16.msra.mxu0 %v3427_v2 }
  0x70   : > { %718 = vst [vmem:[#allocation2 + $0xb0] sm:$0xf] %v663_v13  ;;  %v906_v18 = vshrl.u32 %v2481_v11, 16  ;;  %v909_v19 = vshll.u32 %v2481_v11, 16  ;;  %v915_v20 = vshll.u32 %v2482_v12, 16  ;;  %v677_v21 = vsel %vm3163_vm5, %v672_v14, %v676_v5  ;;  %2170 = vmatprep.subr.bf16.mxu0 %v2993_v42  ;;  %v3476_v59 = vld [vmem:[%s3677_s2 + $0x200] sm:$0xff]  }
  0x71   : > { %v894_v22 = vrot.slane %v892_v15, 4  ;;  %v897_v23 = vrot.slane %v895_v16, 5  ;;  %v2938_v27 = vld [vmem:[#allocation2 + $0x68] ss:$40 sps:$4 sm:$0xff]   ;;  %719 = vst [vmem:[#allocation2 + $0xd8] sm:$0xf] %v677_v21 }
  0x72   : > { %v2935_v26 = vld [vmem:[#allocation2 + $0x6c] ss:$40 sps:$4 sm:$0xff]   ;;  %v903_v25 = vrot.slane %v901_v17, 5  ;;  %v908_v29 = vrot.slane %v906_v18, 4  ;;  %v911_v30 = vrot.slane %v909_v19, 5  ;;  %v917_v31 = vrot.slane %v915_v20, 5  ;;  %2805 = vmatpush1.bf16.msra.mxu1 %v3409_v40 }
  0x73   : > { %v898_v28 = vor.u32 %v897_v23, %v894_v22  ;;  %2135 = vmatprep.mubr.bf16.mxu1 %v2935_v26  ;;  %v2435_v32 = vld [vmem:[%s3137_s12 + $0x38] sm:$0xf]  ;;  %v2436_v33 = vld [vmem:[%s3137_s12 + $0x3c] sm:$0x1]  ;;  %v2437_v34 = vld [vmem:[%s3137_s12 + $0x40] sm:$0xf]  ;;  %2171 = vmatpush1.bf16.msra.mxu0 %v3450_v24 }
  0x74   : > { %2136 = vmatmul.mubr.bf16.gmra.mxu1 %v2938_v27  ;;  %v912_v36 = vor.u32 %v911_v30, %v908_v29  ;;  %v2438_v37 = vld [vmem:[%s3137_s12 + $0x44] sm:$0x1]  ;;  %v679_v38 = vshrl.u32 %v2435_v32, 16  ;;  %v682_v39 = vshll.u32 %v2435_v32, 16  ;;  %v688_v43 = vshll.u32 %v2436_v33, 16  ;;  %2797 = vmatprep.subr.bf16.mxu1 %v2993_v42 }
  0x75   : > { %v899_v35 = vrot.slane %v898_v28, 4  ;;  %v693_v44 = vshrl.u32 %v2437_v34, 16  ;;  %v696_v45 = vshll.u32 %v2437_v34, 16  ;;  %v702_v46 = vshll.u32 %v2438_v37, 16  ;;  %v2451_v47 = vld [vmem:[%s3137_s12 + $0x38] sm:$0xe]  ;;  %2172 = vmatprep.subr.bf16.mxu0 %v2993_v42 }
  0x76   : > { %v913_v50 = vrot.slane %v912_v36, 4  ;;  %v681_v51 = vrot.slane %v679_v38, 4  ;;  %v684_v52 = vrot.slane %v682_v39, 5  ;;  %v2452_v53 = vld [vmem:[%s3137_s12 + $0x3c] sm:$0x1]  ;;  %v690_v40 = vrot.slane %v688_v43, 5  ;;  %2806 = vmatpush1.bf16.msra.mxu1 %v3427_v2 }
  0x77   : > { %v904_v49 = vsel %vm3163_vm5, %v899_v35, %v903_v25  ;;  %v695_v48 = vrot.slane %v693_v44, 4  ;;  %v698_v56 = vrot.slane %v696_v45, 5  ;;  %v704_v57 = vrot.slane %v702_v46, 5  ;;  %v2453_v58 = vld [vmem:[%s3137_s12 + $0x40] sm:$0xe]  ;;  %2173 = vmatpush1.bf16.msra.mxu0 %v3462_v41  ;;  %2798 = vmatprep.subr.bf16.mxu1 %v2993_v42 }
  0x78   : > { %959 = vst [vmem:[#allocation2 + $0xbc] sm:$0xf] %v904_v49  ;;  %v2941_v60 = vld [vmem:[#allocation2 + $0xb4] ss:$40 sps:$4 sm:$0xff]   ;;  %v918_v61 = vsel %vm3163_vm5, %v913_v50, %v917_v31  ;;  %v2945_v62 = vld [vmem:[#allocation2 + $0xb0] ss:$40 sps:$4 sm:$0xff]   ;;  %v685_v63 = vor.u32 %v684_v52, %v681_v51  ;;  %2174 = vmatprep.subr.bf16.mxu0 %v2993_v42 }
  0x79   : > { %v2461_v0 = vrot.slane %v2451_v47, 9  ;;  %960 = vst [vmem:[#allocation2 + $0xe4] sm:$0xf] %v918_v61  ;;  %v699_v1 = vor.u32 %v698_v56, %v695_v48  ;;  %v2454_v3 = vld [vmem:[%s3137_s12 + $0x44] sm:$0x1]  ;;  %v780_v4 = vrot.slane %v2452_v53, 5  ;;  %2078 = vmatprep.mubr.bf16.mxu0 %v2941_v60 }
  0x7a   : > { %v2462_v5 = vrot.slane %v2453_v58, 9  ;;  %v2469_v6 = vld [vmem:[%s3137_s12 + $0x40] sm:$0xf]  ;;  %v686_v7 = vrot.slane %v685_v63, 4  ;;  %v784_v8 = vrot.slane %v2454_v3, 5  ;;  %2079 = vmatmul.mubr.bf16.gmra.mxu0 %v2945_v62  ;;  %2807 = vmatpush1.bf16.msra.mxu1 %v3450_v24 }
  0x7b   : > { %v2470_v9 = vld [vmem:[%s3137_s12 + $0x48] sm:$0xf]  ;;  %817 = vst [vmem:[#allocation2 + $0x108] sm:$0xf] %v2469_v6  ;;  %v2483_v10 = vld [vmem:[%s3137_s12 + $0x40] sm:$0xf]  ;;  %v781_v11 = vsel %vm3157_vm4, %v2461_v0, %v780_v4  ;;  %2175 = vmatpush1.bf16.msra.mxu0 %v3476_v59  ;;  %2799 = vmatprep.subr.bf16.mxu1 %v2993_v42 }
  0x7c   : > { %v700_v2 = vrot.slane %v699_v1, 4  ;;  %818 = vst [vmem:[#allocation2 + $0x130] sm:$0xf] %v2470_v9  ;;  %v2484_v12 = vld [vmem:[%s3137_s12 + $0x44] sm:$0x1]  ;;  %v920_v14 = vshrl.u32 %v2483_v10, 16  ;;  %v691_v15 = vsel %vm3163_vm5, %v686_v7, %v690_v40  ;;  %v785_v16 = vsel %vm3157_vm4, %v2462_v5, %v784_v8  ;;  %2190 = vmatprep.subr.bf16.mxu0 %v2993_v42 }
  0x7d   : > { %v2485_v13 = vld [vmem:[%s3137_s12 + $0x48] sm:$0xf]  ;;  %800 = vst [vmem:[#allocation2 + $0x104] sm:$0xf] %v781_v11  ;;  %v2486_v17 = vld [vmem:[%s3137_s12 + $0x4c] sm:$0x1] }
  0x7e   : > { %v923_v18 = vshll.u32 %v2483_v10, 16  ;;  %v929_v19 = vshll.u32 %v2484_v12, 16  ;;  %v705_v20 = vsel %vm3163_vm5, %v700_v2, %v704_v57  ;;  %720 = vst [vmem:[#allocation2 + $0x100] sm:$0xf] %v691_v15  ;;  %801 = vst [vmem:[#allocation2 + $0x12c] sm:$0xf] %v785_v16  ;;  %2808 = vmatpush1.bf16.msra.mxu1 %v3462_v41 }
  0x7f   : > { %v922_v21 = vrot.slane %v920_v14, 4  ;;  %v934_v22 = vshrl.u32 %v2485_v13, 16  ;;  %v937_v23 = vshll.u32 %v2485_v13, 16  ;;  %721 = vst [vmem:[#allocation2 + $0x128] sm:$0xf] %v705_v20  ;;  %v943_v27 = vshll.u32 %v2486_v17, 16  ;;  %2800 = vmatprep.subr.bf16.mxu1 %v2993_v42 }
  0x80   : > { %v925_v26 = vrot.slane %v923_v18, 5  ;;  %v2943_v28 = vld [vmem:[#allocation2 + $0xbc] ss:$40 sps:$4 sm:$0xff]   ;;  %v2946_v29 = vld [vmem:[#allocation2 + $0xb8] ss:$40 sps:$4 sm:$0xff]   ;;  %v931_v31 = vrot.slane %v929_v19, 5 }
  0x81   : > { %v936_v24 = vrot.slane %v934_v22, 4  ;;  %v939_v25 = vrot.slane %v937_v23, 5  ;;  %v945_v33 = vrot.slane %v943_v27, 5  ;;  %v2957_v34 = vld [vmem:[%s3677_s2 + $0x240] ss:$0 sps:$4 sm:$0x33]   ;;  %2143 = vmatprep.mubr.bf16.mxu1 %v2943_v28 }
  0x82   : > { %v926_v30 = vor.u32 %v925_v26, %v922_v21  ;;  %v2487_v35 = vld [vmem:[%s3137_s12 + $0x10] sm:$0xe]  ;;  %v2488_v37 = vld [vmem:[%s3137_s12 + $0x14] sm:$0x1]  ;;  %v2489_v38 = vld [vmem:[%s3137_s12 + $0x18] sm:$0xe]  ;;  %2144 = vmatmul.mubr.bf16.gmra.mxu1 %v2946_v29 }
  0x83   : > { %v940_v32 = vor.u32 %v939_v25, %v936_v24  ;;  %v2503_v39 = vrot.slane %v2487_v35, 9  ;;  %v1898_v43 = vsel %vm1896_vm6, %v2957_v34, 0  ;;  %v2490_v44 = vld [vmem:[%s3137_s12 + $0x1c] sm:$0x1]  ;;  %v997_v45 = vrot.slane %v2488_v37, 5  ;;  %2809 = vmatpush1.bf16.msra.mxu1 %v3476_v59 }
  0x84   : > { %v927_v36 = vrot.slane %v926_v30, 4  ;;  %v2504_v46 = vrot.slane %v2489_v38, 9  ;;  %2191 = vmatpush2.bf16.msra.mxu0 %v1898_v43  ;;  %v1001_v49 = vrot.slane %v2490_v44, 5  ;;  %v1043_v50 = vld [vmem:[%s3511_s22] sm:$0xf]  ;;  %2801 = vmatprep.subr.bf16.mxu1 %v2993_v42 }
  0x85   : > { %v941_v41 = vrot.slane %v940_v32, 4  ;;  %v1044_v51 = vld [vmem:[%s3511_s22 + $0x4] sm:$0xf]  ;;  %v998_v48 = vsel %vm3157_vm4, %v2503_v39, %v997_v45  ;;  %1052 = vst.msk [vmem:[#allocation2 + $0x24] sm:$0xf] %vm1051_vm7, %v1043_v50 }
  0x86   : > { %v932_v47 = vsel %vm3163_vm5, %v927_v36, %v931_v31  ;;  %v2949_v52 = vld [vmem:[#allocation2 + $0x104] ss:$40 sps:$4 sm:$0xff]   ;;  %v2953_v40 = vld [vmem:[#allocation2 + $0x100] ss:$40 sps:$4 sm:$0xff]   ;;  %1053 = vst.msk [vmem:[#allocation2 + $0x4c] sm:$0xf] %vm1051_vm7, %v1044_v51  ;;  %v1002_v55 = vsel %vm3157_vm4, %v2504_v46, %v1001_v49 }
  0x87   : > { %v946_v53 = vsel %vm3163_vm5, %v941_v41, %v945_v33  ;;  %961 = vst [vmem:[#allocation2 + $0x10c] sm:$0xf] %v932_v47  ;;  %1035 = vst [vmem:[#allocation2 + $0x20] sm:$0xf] %v998_v48  ;;  %v2495_v56 = vld [vmem:[%s3137_s12 + $0x30] sm:$0xe]  ;;  %2086 = vmatprep.mubr.bf16.mxu0 %v2949_v52  ;;  %2810 = vmatpush2.bf16.msra.mxu1 %v1898_v43 }
  0x88   : > { %962 = vst [vmem:[#allocation2 + $0x134] sm:$0xf] %v946_v53  ;;  %v2496_v57 = vld [vmem:[%s3137_s12 + $0x34] sm:$0x1]  ;;  %v2497_v58 = vld [vmem:[%s3137_s12 + $0x38] sm:$0xe]  ;;  %2087 = vmatmul.mubr.bf16.gmra.mxu0 %v2953_v40 }
  0x89   : > { %1036 = vst [vmem:[#allocation2 + $0x48] sm:$0xf] %v1002_v55  ;;  %v2498_v59 = vld [vmem:[%s3137_s12 + $0x3c] sm:$0x1]  ;;  %v2507_v60 = vrot.slane %v2495_v56, 9  ;;  %v1013_v61 = vrot.slane %v2496_v57, 5 }
  0x8a   : > { %v2508_v62 = vrot.slane %v2497_v58, 9  ;;  %v1017_v63 = vrot.slane %v2498_v59, 5  ;;  %v1047_v42 = vld [vmem:[%s3511_s22 + $0x10] sm:$0xf]  ;;  %v1048_v0 = vld [vmem:[%s3511_s22 + $0x14] sm:$0xf] }
  0x8b   : > { %v1014_v1 = vsel %vm3157_vm4, %v2507_v60, %v1013_v61  ;;  %1056 = vst.msk [vmem:[#allocation2 + $0xc4] sm:$0xf] %vm1051_vm7, %v1047_v42  ;;  %1057 = vst.msk [vmem:[#allocation2 + $0xec] sm:$0xf] %vm1051_vm7, %v1048_v0  ;;  %v2491_v3 = vld [vmem:[%s3137_s12 + $0x20] sm:$0xe] }
  0x8c   : > { %v2492_v4 = vld [vmem:[%s3137_s12 + $0x24] sm:$0x1]  ;;  %v2493_v5 = vld [vmem:[%s3137_s12 + $0x28] sm:$0xe]  ;;  %v1018_v6 = vsel %vm3157_vm4, %v2508_v62, %v1017_v63  ;;  %1039 = vst [vmem:[#allocation2 + $0xc0] sm:$0xf] %v1014_v1 }
  0x8d   : > { %v2494_v7 = vld [vmem:[%s3137_s12 + $0x2c] sm:$0x1]  ;;  %v2505_v8 = vrot.slane %v2491_v3, 9  ;;  %v1005_v9 = vrot.slane %v2492_v4, 5  ;;  %v2506_v10 = vrot.slane %v2493_v5, 9 }
  0x8e   : > { %1040 = vst [vmem:[#allocation2 + $0xe8] sm:$0xf] %v1018_v6  ;;  %v1009_v2 = vrot.slane %v2494_v7, 5  ;;  %v1045_v11 = vld [vmem:[%s3511_s22 + $0x8] sm:$0xf] }
  0x8f   : > { %v1046_v12 = vld [vmem:[%s3511_s22 + $0xc] sm:$0xf]  ;;  %v1006_v13 = vsel %vm3157_vm4, %v2505_v8, %v1005_v9  ;;  %1054 = vst.msk [vmem:[#allocation2 + $0x74] sm:$0xf] %vm1051_vm7, %v1045_v11  ;;  %v2499_v14 = vld [vmem:[%s3137_s12 + $0x40] sm:$0xe] }
  0x90   : > { %1055 = vst.msk [vmem:[#allocation2 + $0x9c] sm:$0xf] %vm1051_vm7, %v1046_v12  ;;  %v2500_v15 = vld [vmem:[%s3137_s12 + $0x44] sm:$0x1]  ;;  %v2951_v16 = vld [vmem:[#allocation2 + $0x10c] ss:$40 sps:$4 sm:$0xff]   ;;  %v1010_v18 = vsel %vm3157_vm4, %v2506_v10, %v1009_v2 }
  0x91   : > { %v2954_v17 = vld [vmem:[#allocation2 + $0x108] ss:$40 sps:$4 sm:$0xff]   ;;  %1037 = vst [vmem:[#allocation2 + $0x70] sm:$0xf] %v1006_v13  ;;  %v2509_v19 = vrot.slane %v2499_v14, 9  ;;  %v1021_v21 = vrot.slane %v2500_v15, 5  ;;  %2151 = vmatprep.mubr.bf16.mxu1 %v2951_v16 }
  0x92   : > { %v2958_v20 = vld [vmem:[#allocation2 + $0x20] ss:$40 sps:$4 sm:$0xff]   ;;  %1038 = vst [vmem:[#allocation2 + $0x98] sm:$0xf] %v1010_v18  ;;  %v2960_v22 = vld [vmem:[#allocation2 + $0x24] ss:$40 sps:$4 sm:$0xff]   ;;  %2152 = vmatmul.mubr.bf16.gmra.mxu1 %v2954_v17 }
  0x93   : > { %v2501_v23 = vld [vmem:[%s3137_s12 + $0x48] sm:$0xe]  ;;  %v2502_v26 = vld [vmem:[%s3137_s12 + $0x4c] sm:$0x1]  ;;  %v1022_v27 = vsel %vm3157_vm4, %v2509_v19, %v1021_v21  ;;  %v1049_v28 = vld [vmem:[%s3511_s22 + $0x18] sm:$0xf]  ;;  %2625 = vmatprep.mubr.msk.bf16.mxu0 %vm1883_vm8, %v2960_v22 }
  0x94   : > { %v2510_v24 = vrot.slane %v2501_v23, 9  ;;  %v1025_v25 = vrot.slane %v2502_v26, 5  ;;  %v1050_v29 = vld [vmem:[%s3511_s22 + $0x1c] sm:$0xf]  ;;  %1041 = vst [vmem:[#allocation2 + $0x110] sm:$0xf] %v1022_v27  ;;  %2193 = vmatmul.mubr.bf16.vlgmr.msra.gmra.mxu0 %v2958_v20 }
  0x95   : > { %1058 = vst.msk [vmem:[#allocation2 + $0x114] sm:$0xf] %vm1051_vm7, %v1049_v28  ;;  %1059 = vst.msk [vmem:[#allocation2 + $0x13c] sm:$0xf] %vm1051_vm7, %v1050_v29  ;;  %v2963_v30 = vld [vmem:[#allocation2 + $0xc4] ss:$40 sps:$4 sm:$0xff]  }
  0x96   : > { %v1026_v31 = vsel %vm3157_vm4, %v2510_v24, %v1025_v25  ;;  %v2961_v32 = vld [vmem:[#allocation2 + $0xc0] ss:$40 sps:$4 sm:$0xff]   ;;  %2627 = vmatprep.mubr.msk.bf16.mxu1 %vm1883_vm8, %v2963_v30 }
  0x97   : > { %1042 = vst [vmem:[#allocation2 + $0x138] sm:$0xf] %v1026_v31  ;;  %v2964_v35 = vld [vmem:[#allocation2 + $0x74] ss:$40 sps:$4 sm:$0xff]   ;;  %v3616_v28 = vld [vmem:[%s3678_s3] ss:$0 sm:$0xff] }
  0x98   : > { %v1074_v33 = vld [vmem:[#allocation2 + $0x70] sm:$0xff]  ;;  %2626 = vmatprep.mubr.msk.bf16.mxu0 %vm1883_vm8, %v2964_v35 }
  0x99   : > { %v1079_v34 = vld [vmem:[#allocation2 + $0x98] sm:$0xff] }
  0x9a   : > { %v2530_v36 = vcombine.low %v1074_v33, %v1079_v34  ;;  %2209 = vmatmul.mubr.bf16.vlgmr.msra.gmra.mxu1 %v2961_v32 }
  0x9c   : > { %v2966_v37 = vld [vmem:[#allocation2 + $0x114] ss:$40 sps:$4 sm:$0xff]   ;;  %2201 = vmatmul.mubr.bf16.gmra.mxu0 %v2530_v36 }
  0x9d   : > { %2628 = vmatprep.mubr.msk.bf16.mxu1 %vm1883_vm8, %v2966_v37 }
  0x9e   : > { %v2968_v38 = vld [vmem:[#allocation2 + $0x110] ss:$40 sps:$4 sm:$0xff]  }
  0xa2   : > { %2217 = vmatmul.mubr.bf16.gmra.mxu1 %v2968_v38 }
  0xee   : > { %v2649_v39 = vpop.f32.mrf.mxu0 }
  0xef   : > { %v2689_v41 = vpop.f32.mrf.mxu1 }
  0xf0   : > { %v2650_v54 = vpop.f32.mrf.mxu0 }
  0xf1   : > { %v2690_v44 = vpop.f32.mrf.mxu1  ;;  %v2651_v24 = vadd.f32 %v2650_v54, %v2649_v39 }
  0xf2   : > { %v2652_v43 = vpop.f32.mrf.mxu0  ;;  %v2691_v35 = vadd.f32 %v2690_v44, %v2689_v41 }
  0xf3   : > { %v2692_v46 = vpop.f32.mrf.mxu1  ;;  %v1935_v32 = vadd.f32 %v2651_v24, %v3616_v28 }
  0xf4   : > { %v2653_v45 = vpop.f32.mrf.mxu0 }
  0xf5   : > { %v2693_v49 = vpop.f32.mrf.mxu1  ;;  %v2654_v31 = vadd.f32 %v2653_v45, %v2652_v43 }
  0xf7   : > { %v3573_v51 = vpop.f32.mrf.mxu1  ;;  %v1938_v38 = vadd.f32 %v2654_v31, %v3616_v28 }
  0xf9   : > { %v3577_v53 = vpop.f32.mrf.mxu1 }
  0xfb   : > { %v3581_v48 = vpop.f32.mrf.mxu1 }
  0xfd   : > { %v3583_v56 = vpop.f32.mrf.mxu1 }
  0xfe   : > { %v2655_v47 = vpop.f32.mrf.mxu0 }
 0x100   : > { %v2656_v50 = vpop.f32.mrf.mxu0 }
 0x101   : > { %v2657_v39 = vadd.f32 %v2656_v50, %v2655_v47 }
 0x102   : > { %v3575_v52 = vpop.f32.mrf.mxu0 }
 0x103   : > { %v2701_v58 = vpop.f32.mrf.mxu1  ;;  %v1943_v41 = vadd.f32 %v2657_v39, %v3616_v28 }
 0x104   : > { %v3579_v40 = vpop.f32.mrf.mxu0 }
 0x105   : > { %v2702_v60 = vpop.f32.mrf.mxu1  ;;  %v2660_v44 = vadd.f32 %v3579_v40, %v3575_v52 }
 0x106   : > { %v2661_v55 = vpop.f32.mrf.mxu0 }
 0x107   : > { %v3585_v62 = vpop.f32.mrf.mxu1 }
 0x108   : > { %v2662_v57 = vpop.f32.mrf.mxu0 }
 0x109   : > { %v3587_v42 = vpop.f32.mrf.mxu1  ;;  %v2663_v36 = vadd.f32 %v2662_v57, %v2661_v55  ;;  %v2703_v55 = vadd.f32 %v2702_v60, %v2701_v58 }
 0x10a   : > { %v2664_v59 = vpop.f32.mrf.mxu0  ;;  %v2706_v40 = vadd.f32 %v3587_v42, %v3585_v62 }
 0x10b   : > { %v1951_v43 = vadd.f32 %v2663_v36, %v3616_v28 }
 0x10c   : > { %v2665_v61 = vpop.f32.mrf.mxu0 }
 0x10e   : > { %v3589_v1 = vpop.f32.mrf.mxu1 }
 0x10f   : > { %3684 = vst [vmem:[#allocation3_spill] sm:$0xff] %v3589_v1 }
 0x110   : > { %v3593_v4 = vpop.f32.mrf.mxu1 }
 0x111   : > { %3685 = vst [vmem:[#allocation4_spill] sm:$0xff] %v3593_v4 }
 0x112   : > { %v2667_v63 = vpop.f32.mrf.mxu0  ;;  %v3597_v6 = vpop.f32.mrf.mxu1 }
 0x113   : > { %3686 = vst [vmem:[#allocation5_spill] sm:$0xff] %v3597_v6 }
 0x114   : > { %v2668_v0 = vpop.f32.mrf.mxu0  ;;  %v3599_v9 = vpop.f32.mrf.mxu1 }
 0x115   : > { %3687 = vst [vmem:[#allocation6_spill] sm:$0xff] %v3599_v9  ;;  %v2666_v9 = vadd.f32 %v2665_v61, %v2664_v59  ;;  %v2669_v57 = vadd.f32 %v2668_v0, %v2667_v63  ;;  %v1946_v63 = vadd.f32 %v2660_v44, %v3616_v28 }
 0x116   : > { %v3591_v3 = vpop.f32.mrf.mxu0 }
 0x118   : > { %v3595_v5 = vpop.f32.mrf.mxu0 }
 0x11c   : > { %v3693_v39 = vld [vmem:[#allocation6_spill] sm:$0xff] }
 0x11d   : > { %v2729_v7 = vpop.f32.mrf.mxu0 }
 0x11f   : > { %v2730_v8 = vpop.f32.mrf.mxu0 }
 0x120   : > { %v2731_v37 = vadd.f32 %v2730_v8, %v2729_v7  ;;  %v2700_v8 = vadd.f32 %v3583_v56, %v3581_v48  ;;  %v1959_v48 = vadd.f32 %v2669_v57, %v3616_v28  ;;  %v2672_v56 = vadd.f32 %v3595_v5, %v3591_v3 }
 0x121   : > { %v2732_v10 = vpop.f32.mrf.mxu0 }
 0x123   : > { %v2733_v11 = vpop.f32.mrf.mxu0 }
 0x124   : > { %v2734_v6 = vadd.f32 %v2733_v11, %v2732_v10  ;;  %v2016_v10 = vadd.f32 %v2703_v55, %v1951_v43 }
 0x125   : > { %v2769_v2 = vpop.f32.mrf.mxu1 }
 0x127   : > { %v2770_v12 = vpop.f32.mrf.mxu1 }
 0x128   : > { %v2771_v47 = vadd.f32 %v2770_v12, %v2769_v2 }
 0x129   : > { %v2772_v13 = vpop.f32.mrf.mxu1 }
 0x12a   : > { %v2735_v14 = vpop.f32.mrf.mxu0 }
 0x12b   : > { %v2773_v16 = vpop.f32.mrf.mxu1 }
 0x12c   : > { %v2736_v15 = vpop.f32.mrf.mxu0  ;;  %v2774_v58 = vadd.f32 %v2773_v16, %v2772_v13 }
 0x12d   : > { %v2737_v11 = vadd.f32 %v2736_v15, %v2735_v14 }
 0x12e   : > { %v3601_v17 = vpop.f32.mrf.mxu0 }
 0x130   : > { %v3607_v20 = vpop.f32.mrf.mxu0 }
 0x131   : > { %v2740_v15 = vadd.f32 %v3607_v20, %v3601_v17 }
 0x134   : > { %v3603_v18 = vpop.f32.mrf.mxu1 }
 0x136   : > { %v3605_v19 = vpop.f32.mrf.mxu1 }
 0x137   : > { %v2777_v14 = vadd.f32 %v3605_v19, %v3603_v18 }
 0x138   : > { %v3609_v21 = vpop.f32.mrf.mxu1 }
 0x139   : > { %3688 = vst [vmem:[#allocation7_spill] sm:$0xff] %v3609_v21  ;;  %v2694_v21 = vadd.f32 %v2693_v49, %v2692_v46  ;;  %v2697_v46 = vadd.f32 %v3577_v53, %v3573_v51  ;;  %v1954_v49 = vadd.f32 %v2666_v9, %v3616_v28 }
 0x13a   : > { %v2741_v22 = vpop.f32.mrf.mxu0  ;;  %v3611_v26 = vpop.f32.mrf.mxu1 }
 0x13b   : > { %3689 = vst [vmem:[#allocation8_spill] sm:$0xff] %v3611_v26  ;;  %v2000_v26 = vadd.f32 %v2691_v35, %v1935_v32  ;;  %v2003_v24 = vadd.f32 %v2694_v21, %v1938_v38  ;;  %v2008_v52 = vadd.f32 %v2697_v46, %v1943_v41  ;;  %v2019_v2 = vadd.f32 %v2706_v40, %v1954_v49 }
 0x13c   : > { %v2742_v23 = vpop.f32.mrf.mxu0  ;;  %v1962_v35 = vadd.f32 %v2672_v56, %v3616_v28 }
 0x13d   : > { %v2065_v45 = vadd.f32 %v2731_v37, %v2000_v26  ;;  %v2743_v50 = vadd.f32 %v2742_v23, %v2741_v22  ;;  %v2068_v59 = vadd.f32 %v2734_v6, %v2003_v24  ;;  %v2073_v13 = vadd.f32 %v2737_v11, %v2008_v52  ;;  %v3690_v22 = vld [vmem:[#allocation3_spill] sm:$0xff]  ;;  %v3691_v23 = vld [vmem:[#allocation4_spill] sm:$0xff] }
 0x13e   : > { %v2744_v27 = vpop.f32.mrf.mxu0  ;;  %v2709_v3 = vadd.f32 %v3691_v23, %v3690_v22 }
 0x13f   : > { %v2130_v21 = vadd.f32 %v2771_v47, %v2065_v45  ;;  %v2081_v0 = vadd.f32 %v2743_v50, %v2016_v10  ;;  %v2133_v42 = vadd.f32 %v2774_v58, %v2068_v59  ;;  %v2138_v38 = vadd.f32 %v2777_v14, %v2073_v13 }
 0x140   : > { %v2745_v29 = vpop.f32.mrf.mxu0  ;;  %v2024_v32 = vadd.f32 %v2709_v3, %v1959_v48  ;;  %v3694_v43 = vld [vmem:[#allocation7_spill] sm:$0xff] }
 0x141   : > { %v2746_v60 = vadd.f32 %v2745_v29, %v2744_v27  ;;  %v2011_v29 = vadd.f32 %v2700_v8, %v1946_v63 }
 0x142   : > { %v2781_v25 = vpop.f32.mrf.mxu1  ;;  %v3695_v45 = vld [vmem:[#allocation8_spill] sm:$0xff] }
 0x143   : > { %v2084_v5 = vadd.f32 %v2746_v60, %v2019_v2  ;;  %v2076_v20 = vadd.f32 %v2740_v15, %v2011_v29  ;;  %v2780_v24 = vadd.f32 %v3695_v45, %v3694_v43 }
 0x144   : > { %v2782_v30 = vpop.f32.mrf.mxu1 }
 0x145   : > { %v2783_v6 = vadd.f32 %v2782_v30, %v2781_v25  ;;  %v2141_v10 = vadd.f32 %v2780_v24, %v2076_v20 }
 0x146   : > { %v3619_v33 = vpop.f32.mrf.mxu1 }
 0x147   : > { %v2146_v30 = vadd.f32 %v2783_v6, %v2081_v0 }
 0x148   : > { %v2747_v34 = vpop.f32.mrf.mxu0  ;;  %v2785_v4 = vpop.f32.mrf.mxu1 }
 0x149   : > { %v2786_v18 = vadd.f32 %v2785_v4, %v3619_v33 }
 0x14a   : > { %v2748_v54 = vpop.f32.mrf.mxu0 }
 0x14b   : > { %v2749_v26 = vadd.f32 %v2748_v54, %v2747_v34  ;;  %v3692_v34 = vld [vmem:[#allocation5_spill] sm:$0xff]  ;;  %v2149_v55 = vadd.f32 %v2786_v18, %v2084_v5 }
 0x14c   : > { %v3622_v1 = vpop.f32.mrf.mxu0  ;;  %v2712_v54 = vadd.f32 %v3693_v39, %v3692_v34 }
 0x14d   : > { %v2089_v41 = vadd.f32 %v2749_v26, %v2024_v32 }
 0x14e   : > { %v2751_v7 = vpop.f32.mrf.mxu0  ;;  %v2027_v57 = vadd.f32 %v2712_v54, %v1962_v35 }
 0x14f   : > { %v2752_v4 = vadd.f32 %v2751_v7, %v3622_v1 }
 0x151   : > { %v2092_v52 = vadd.f32 %v2752_v4, %v2027_v57 }
 0x152   : > { %v2787_v61 = vpop.f32.mrf.mxu1 }
 0x154   : > { %v2788_v51 = vpop.f32.mrf.mxu1  ;;  %v2194_v53 = vpop.f32.mrf.mxu0 }
 0x155   : > { %v2195_v9 = vadd.f32 %v2194_v53, %v2130_v21  ;;  %v2789_v47 = vadd.f32 %v2788_v51, %v2787_v61 }
 0x156   : > { %v2790_v12 = vpop.f32.mrf.mxu1  ;;  %v2196_v62 = vpop.f32.mrf.mxu0 }
 0x157   : > { %v2225_v16 = vmax.f32 %v2195_v9, 0.0  ;;  %v2154_v40 = vadd.f32 %v2789_v47, %v2089_v41 }
 0x158   : > { %v2791_v27 = vpop.f32.mrf.mxu1  ;;  %v2197_v25 = vpop.f32.mrf.mxu0 }
 0x159   : > { %2233 = vst [vmem:[%s3643_s26] sm:$0xff] %v2225_v16  ;;  %v2198_v31 = vadd.f32 %v2197_v25, %v2133_v42  ;;  %v2792_v60 = vadd.f32 %v2791_v27, %v2790_v12 }
 0x15a   : > { %v2210_v19 = vpop.f32.mrf.mxu1  ;;  %v2199_v17 = vpop.f32.mrf.mxu0 }
 0x15b   : > { %v2211_v36 = vadd.f32 %v2210_v19, %v2146_v30  ;;  %v2226_v37 = vmax.f32 %v2198_v31, 0.0  ;;  %v2157_v6 = vadd.f32 %v2792_v60, %v2092_v52 }
 0x15c   : > { %v2212_v44 = vpop.f32.mrf.mxu1  ;;  %v2202_v28 = vpop.f32.mrf.mxu0 }
 0x15d   : > { %v2229_v33 = vmax.f32 %v2211_v36, 0.0  ;;  %2234 = vst [vmem:[%s3643_s26 + $0x8] sm:$0xff] %v2226_v37  ;;  %v2203_v50 = vadd.f32 %v2202_v28, %v2138_v38 }
 0x15e   : > { %v2213_v46 = vpop.f32.mrf.mxu1  ;;  %v2204_v49 = vpop.f32.mrf.mxu0 }
 0x15f   : > { %2237 = vst [vmem:[%s3643_s26 + $0x20] sm:$0xff] %v2229_v33  ;;  %v2214_v59 = vadd.f32 %v2213_v46, %v2149_v55  ;;  %v2227_v8 = vmax.f32 %v2203_v50, 0.0 }
 0x160   : > { %v2215_v11 = vpop.f32.mrf.mxu1  ;;  %v2205_v21 = vpop.f32.mrf.mxu0 }
 0x161   : > { %v2230_v61 = vmax.f32 %v2214_v59, 0.0  ;;  %2235 = vst [vmem:[%s3643_s26 + $0x10] sm:$0xff] %v2227_v8  ;;  %v2206_v1 = vadd.f32 %v2205_v21, %v2141_v10 }
 0x162   : > { %v2218_v7 = vpop.f32.mrf.mxu1  ;;  %v2207_v58 = vpop.f32.mrf.mxu0 }
 0x163   : > { %2238 = vst [vmem:[%s3643_s26 + $0x28] sm:$0xff] %v2230_v61  ;;  %v2219_v51 = vadd.f32 %v2218_v7, %v2154_v40  ;;  %v2228_v53 = vmax.f32 %v2206_v1, 0.0 }
 0x164   : > { %v2220_v63 = vpop.f32.mrf.mxu1 }
 0x165   : > { %v2231_v0 = vmax.f32 %v2219_v51, 0.0  ;;  %2236 = vst [vmem:[%s3643_s26 + $0x18] sm:$0xff] %v2228_v53 }
 0x166   : > { %v2221_v9 = vpop.f32.mrf.mxu1 }
 0x167   : > { %2239 = vst [vmem:[%s3643_s26 + $0x30] sm:$0xff] %v2231_v0  ;;  %v2222_v2 = vadd.f32 %v2221_v9, %v2157_v6 }
 0x168   : > { %v2223_v48 = vpop.f32.mrf.mxu1 }
 0x169   : > { %v2232_v56 = vmax.f32 %v2222_v2, 0.0 }
 0x16b   : > { %2240 = vst [vmem:[%s3643_s26 + $0x38] sm:$0xff] %v2232_v56 }
 0x16c PF: > { %s14_s17 = sadd.s32 1, %s2991_s17   ;;  %s3696_s15 = smov %s2987_s16 }
 0x16d   : > { %p11_p5 = scmp.ge.s32.totalorder %s14_s17, 4   ;;  %s3697_s16 = smov %s3699_s18 }
 0x16f   :  { %13 = sbr.rel (!%p11_p5) target bundleno = 2 (0x2), region = 77 }

</bundles_post_ra>
